<compile_context>
chip_gen: v7x
topology: tpu7x:2x2x1
jax: 0.10.0
libtpu: 0.0.40
codegen_flags: <defaults>
</compile_context>

<pallas_src>
import jax
import jax.numpy as jnp
from jax.experimental import pallas as pl
from jax.experimental.pallas import tpu as pltpu


# ----------------------------------------------------------------------------
# Pallas kernels
# ----------------------------------------------------------------------------
def _conv12_kernel(p_ref, w1_ref, b1_ref, w2_ref, b2_ref, o_ref):
    # p_ref : (K1p, tm) bf16 conv1 patch tile        w1_ref: (64, K1p) bf16
    # b1_ref: (64, 1) f32                            w2_ref: (32, 64)  bf16
    # b2_ref: (32, 1) f32                            o_ref : (32, tm)  bf16
    h = jnp.dot(w1_ref[...], p_ref[...], preferred_element_type=jnp.float32)
    h = jnp.maximum(h + b1_ref[...], 0.0)                      # conv1 + ReLU
    y = jnp.dot(w2_ref[...], h.astype(jnp.bfloat16),
                preferred_element_type=jnp.float32)
    y = jnp.maximum(y + b2_ref[...], 0.0)                      # conv2 + ReLU
    o_ref[...] = y.astype(o_ref.dtype)


def _conv_kernel(p_ref, w_ref, b_ref, o_ref):
    # p_ref: (K, tm) bf16   w_ref: (Cout_pad, K) bf16   b_ref: (Cout_pad, 1) f32
    y = jnp.dot(w_ref[...], p_ref[...], preferred_element_type=jnp.float32)
    o_ref[...] = (y + b_ref[...]).astype(o_ref.dtype)


# ----------------------------------------------------------------------------
# Glue helpers (plain JAX)
# ----------------------------------------------------------------------------
def _choose_tile(m):
    tm = 512 if m >= 4096 else 256
    m_pad = pl.cdiv(m, tm) * tm
    return tm, m_pad


def _im2col_t(x_cm, kh, kw):
    """Channel-major transposed im2col.

    x_cm: (C, N, Hp, Wp) spatially pre-padded tensor.
    Returns patches (C*kh*kw, N*Ho*Wo) with row index ci*kh*kw + dy*kw + dx
    (matching weight.reshape(Cout, Cin*kh*kw)), plus (Ho, Wo).
    """
    c, n, hp, wp = x_cm.shape
    ho, wo = hp - kh + 1, wp - kw + 1
    taps = []
    for dy in range(kh):
        for dx in range(kw):
            taps.append(x_cm[:, :, dy:dy + ho, dx:dx + wo])     # (C, N, Ho, Wo)
    p = jnp.stack(taps, axis=1)                                 # (C, kh*kw, N, Ho, Wo)
    return p.reshape(c * kh * kw, n * ho * wo), ho, wo


# ----------------------------------------------------------------------------
# DeblurCNN forward
# ----------------------------------------------------------------------------
def init_params(key):
    k1, k2, k3, k4, k5, k6 = jax.random.split(key, 6)
    return {
        "conv1_w": jax.random.normal(k1, (64, 3, 9, 9), jnp.float32) * 0.05,
        "conv1_b": jax.random.normal(k2, (64,), jnp.float32) * 0.05,
        "conv2_w": jax.random.normal(k3, (32, 64, 1, 1), jnp.float32) * 0.05,
        "conv2_b": jax.random.normal(k4, (32,), jnp.float32) * 0.05,
        "conv3_w": jax.random.normal(k5, (3, 32, 5, 5), jnp.float32) * 0.05,
        "conv3_b": jax.random.normal(k6, (3,), jnp.float32) * 0.05,
    }


@jax.jit
def deblur_cnn_forward(params, x):
    # x: (N, 3, H, W) NCHW float32
    n, _, h, w = x.shape
    f32, bf16 = jnp.float32, jnp.bfloat16

    # ---- conv1 (9x9, pad 2) + ReLU, fused with conv2 (1x1) + ReLU -----------
    x_cm = jnp.transpose(x.astype(f32), (1, 0, 2, 3))            # (3, N, H, W)
    x_cm = jnp.pad(x_cm, ((0, 0), (0, 0), (2, 2), (2, 2)))       # (3, N, H+4, W+4)
    p1, h1, w1sp = _im2col_t(x_cm, 9, 9)                         # (243, M1), H-4, W-4
    k1, m1 = p1.shape
    k1p = 256                                                    # pad K: 243 -> 256
    tm1, m1p = _choose_tile(m1)
    p1 = jnp.pad(p1, ((0, k1p - k1), (0, m1p - m1))).astype(bf16)

    w1t = jnp.pad(params["conv1_w"].reshape(64, k1),
                  ((0, 0), (0, k1p - k1))).astype(bf16)          # (64, 256)
    b1 = params["conv1_b"].reshape(64, 1).astype(f32)
    w2t = params["conv2_w"].reshape(32, 64).astype(bf16)
    b2 = params["conv2_b"].reshape(32, 1).astype(f32)

    cost12 = pl.CostEstimate(
        flops=2 * m1p * (k1p * 64 + 64 * 32),
        transcendentals=0,
        bytes_accessed=(k1p * m1p + 64 * k1p + 32 * 64 + 32 * m1p) * 2 + (64 + 32) * 4,
    )
    y2_int = pl.pallas_call(
        _conv12_kernel,
        out_shape=jax.ShapeDtypeStruct((32, m1p), bf16),
        grid=(m1p // tm1,),
        in_specs=[
            pl.BlockSpec((k1p, tm1), lambda i: (0, i)),          # patch tile
            pl.BlockSpec((64, k1p), lambda i: (0, 0)),           # conv1 weight (resident)
            pl.BlockSpec((64, 1), lambda i: (0, 0)),             # conv1 bias
            pl.BlockSpec((32, 64), lambda i: (0, 0)),            # conv2 weight (resident)
            pl.BlockSpec((32, 1), lambda i: (0, 0)),             # conv2 bias
        ],
        out_specs=pl.BlockSpec((32, tm1), lambda i: (0, i)),
        compiler_params=pltpu.CompilerParams(dimension_semantics=("parallel",)),
        cost_estimate=cost12,
    )(p1, w1t, b1, w2t, b2)

    # conv2's pad=2 border only ever sees zero-padded conv1 output -> relu(b2).
    y2_int = y2_int[:, :m1].reshape(32, n, h1, w1sp)
    border = jnp.maximum(params["conv2_b"], 0.0).astype(bf16)
    y2 = jnp.broadcast_to(border[:, None, None, None], (32, n, h, w))
    y2 = y2.at[:, :, 2:2 + h1, 2:2 + w1sp].set(y2_int)           # (32, N, H, W)

    # ---- conv3 (5x5, pad 2), no activation ----------------------------------
    y2p = jnp.pad(y2, ((0, 0), (0, 0), (2, 2), (2, 2)))          # (32, N, H+4, W+4)
    p3, h3, w3sp = _im2col_t(y2p, 5, 5)                          # (800, M3)
    k3, m3 = p3.shape                                            # K=800 is 8-aligned
    tm3, m3p = _choose_tile(m3)
    p3 = jnp.pad(p3, ((0, 0), (0, m3p - m3))).astype(bf16)

    coutp = 8                                                    # pad Cout 3 -> 8 sublanes
    w3t = jnp.pad(params["conv3_w"].reshape(3, k3),
                  ((0, coutp - 3), (0, 0))).astype(bf16)         # (8, 800)
    b3 = jnp.pad(params["conv3_b"], (0, coutp - 3)).reshape(coutp, 1).astype(f32)

    cost3 = pl.CostEstimate(
        flops=2 * m3p * k3 * coutp,
        transcendentals=0,
        bytes_accessed=(k3 * m3p + coutp * k3) * 2 + coutp * 4 + coutp * m3p * 4,
    )
    y3 = pl.pallas_call(
        _conv_kernel,
        out_shape=jax.ShapeDtypeStruct((coutp, m3p), f32),
        grid=(m3p // tm3,),
        in_specs=[
            pl.BlockSpec((k3, tm3), lambda i: (0, i)),
            pl.BlockSpec((coutp, k3), lambda i: (0, 0)),
            pl.BlockSpec((coutp, 1), lambda i: (0, 0)),
        ],
        out_specs=pl.BlockSpec((coutp, tm3), lambda i: (0, i)),
        compiler_params=pltpu.CompilerParams(dimension_semantics=("parallel",)),
        cost_estimate=cost3,
    )(p3, w3t, b3)

    y3 = y3[:3, :m3].reshape(3, n, h3, w3sp)
    return jnp.transpose(y3, (1, 0, 2, 3))                       # back to NCHW


# ----------------------------------------------------------------------------
# Pure-JAX f32 reference (correctness check)
# ----------------------------------------------------------------------------
def _ref_conv(x, wgt, b, pad):
    y = jax.lax.conv_general_dilated(
        x, wgt, window_strides=(1, 1), padding=[(pad, pad), (pad, pad)],
        dimension_numbers=("NCHW", "OIHW", "NCHW"))
    return y + b.reshape(1, -1, 1, 1)


def deblur_cnn_reference(params, x):
    x = jax.nn.relu(_ref_conv(x, params["conv1_w"], params["conv1_b"], 2))
    x = jax.nn.relu(_ref_conv(x, params["conv2_w"], params["conv2_b"], 2))
    return _ref_conv(x, params["conv3_w"], params["conv3_b"], 2)


if __name__ == "__main__":
    key = jax.random.PRNGKey(0)
    pkey, xkey = jax.random.split(key)
    params = init_params(pkey)

    # Small NCHW input consistent with the module (3 input channels).
    x = jax.random.normal(xkey, (2, 3, 16, 16), jnp.float32)

    out = jax.block_until_ready(deblur_cnn_forward(params, x))
    ref = deblur_cnn_reference(params, x)

    assert out.shape == ref.shape == (2, 3, 16, 16), (out.shape, ref.shape)
    max_err = float(jnp.max(jnp.abs(out - ref)))
    # bf16 patch/weight path vs f32 reference -> modest tolerance.
    assert jnp.allclose(out, ref, atol=5e-2, rtol=5e-2), max_err

    print("KERNEL_OK")
</pallas_src>

<mosaic_0001>
module attributes {stable_mosaic.version = 11 : i64} {
  func.func @_conv12_kernel(%arg0: i32, %arg1: memref<256x256xbf16, #tpu.memory_space<vmem>>, %arg2: memref<64x256xbf16, #tpu.memory_space<vmem>>, %arg3: memref<64x1xf32, #tpu.memory_space<vmem>>, %arg4: memref<32x64xbf16, #tpu.memory_space<vmem>>, %arg5: memref<32x1xf32, #tpu.memory_space<vmem>>, %arg6: memref<32x256xbf16, #tpu.memory_space<vmem>>) attributes {dimension_semantics = [#tpu.dimension_semantics<parallel>], iteration_bounds = array<i64: 2>, scalar_prefetch = 0 : i64, scratch_operands = 0 : i64, tpu.core_type = #tpu.core_type<tc>, window_params = [{transform_indices = @transform_0, window_bounds = array<i64: 256, 256>}, {pipeline_mode = #tpu.pipeline_mode<synchronous>, transform_indices = @transform_1, window_bounds = array<i64: 64, 256>}, {pipeline_mode = #tpu.pipeline_mode<synchronous>, transform_indices = @transform_2, window_bounds = array<i64: 64, 1>}, {pipeline_mode = #tpu.pipeline_mode<synchronous>, transform_indices = @transform_3, window_bounds = array<i64: 32, 64>}, {pipeline_mode = #tpu.pipeline_mode<synchronous>, transform_indices = @transform_4, window_bounds = array<i64: 32, 1>}, {transform_indices = @transform_5, window_bounds = array<i64: 32, 256>}]} {
    %c0 = arith.constant 0 : index
    %c0_0 = arith.constant 0 : index
    %0 = vector.load %arg2[%c0, %c0_0] : memref<64x256xbf16, #tpu.memory_space<vmem>>, vector<64x256xbf16>
    %c0_1 = arith.constant 0 : index
    %c0_2 = arith.constant 0 : index
    %1 = vector.load %arg1[%c0_1, %c0_2] : memref<256x256xbf16, #tpu.memory_space<vmem>>, vector<256x256xbf16>
    %cst = arith.constant dense<0.000000e+00> : vector<64x256xf32>
    %2 = tpu.matmul %0, %1, %cst {dimension_numbers = #tpu.dot_dimension_numbers<[1], [0], [0], [1], [0, 0, 1, 1], [], []>} : vector<64x256xbf16>, vector<256x256xbf16>, vector<64x256xf32> -> vector<64x256xf32>
    %c0_3 = arith.constant 0 : index
    %c0_4 = arith.constant 0 : index
    %3 = vector.load %arg3[%c0_3, %c0_4] : memref<64x1xf32, #tpu.memory_space<vmem>>, vector<64x1xf32>
    %4 = vector.broadcast %3 : vector<64x1xf32> to vector<64x256xf32>
    %5 = arith.addf %2, %4 : vector<64x256xf32>
    %cst_5 = arith.constant 0.000000e+00 : f32
    %6 = vector.broadcast %cst_5 : f32 to vector<64x256xf32>
    %7 = arith.maximumf %5, %6 : vector<64x256xf32>
    %c0_6 = arith.constant 0 : index
    %c0_7 = arith.constant 0 : index
    %8 = vector.load %arg4[%c0_6, %c0_7] : memref<32x64xbf16, #tpu.memory_space<vmem>>, vector<32x64xbf16>
    %9 = arith.truncf %7 : vector<64x256xf32> to vector<64x256xbf16>
    %cst_8 = arith.constant dense<0.000000e+00> : vector<32x256xf32>
    %10 = tpu.matmul %8, %9, %cst_8 {dimension_numbers = #tpu.dot_dimension_numbers<[1], [0], [0], [1], [0, 0, 1, 1], [], []>} : vector<32x64xbf16>, vector<64x256xbf16>, vector<32x256xf32> -> vector<32x256xf32>
    %c0_9 = arith.constant 0 : index
    %c0_10 = arith.constant 0 : index
    %11 = vector.load %arg5[%c0_9, %c0_10] : memref<32x1xf32, #tpu.memory_space<vmem>>, vector<32x1xf32>
    %12 = vector.broadcast %11 : vector<32x1xf32> to vector<32x256xf32>
    %13 = arith.addf %10, %12 : vector<32x256xf32>
    %cst_11 = arith.constant 0.000000e+00 : f32
    %14 = vector.broadcast %cst_11 : f32 to vector<32x256xf32>
    %15 = arith.maximumf %13, %14 : vector<32x256xf32>
    %16 = arith.truncf %15 : vector<32x256xf32> to vector<32x256xbf16>
    %c0_12 = arith.constant 0 : index
    %c0_13 = arith.constant 0 : index
    %17 = vector.load %arg6[%c0_12, %c0_13] : memref<32x256xbf16, #tpu.memory_space<vmem>>, vector<32x256xbf16>
    tpu.vector_store %arg6[%c0_12, %c0_13], %16 {strides = array<i32>} : memref<32x256xbf16, #tpu.memory_space<vmem>>, vector<32x256xbf16>,
    return
  }
  func.func @transform_0(%arg0: i32) -> (i32, i32) {
    %c0_i32 = arith.constant 0 : i32
    %c0_i32_0 = arith.constant 0 : i32
    return %c0_i32, %arg0 : i32, i32
  }
  func.func @transform_1(%arg0: i32) -> (i32, i32) {
    %c0_i32 = arith.constant 0 : i32
    %c0_i32_0 = arith.constant 0 : i32
    %c0_i32_1 = arith.constant 0 : i32
    return %c0_i32, %c0_i32_0 : i32, i32
  }
  func.func @transform_2(%arg0: i32) -> (i32, i32) {
    %c0_i32 = arith.constant 0 : i32
    %c0_i32_0 = arith.constant 0 : i32
    %c0_i32_1 = arith.constant 0 : i32
    return %c0_i32, %c0_i32_0 : i32, i32
  }
  func.func @transform_3(%arg0: i32) -> (i32, i32) {
    %c0_i32 = arith.constant 0 : i32
    %c0_i32_0 = arith.constant 0 : i32
    %c0_i32_1 = arith.constant 0 : i32
    return %c0_i32, %c0_i32_0 : i32, i32
  }
  func.func @transform_4(%arg0: i32) -> (i32, i32) {
    %c0_i32 = arith.constant 0 : i32
    %c0_i32_0 = arith.constant 0 : i32
    %c0_i32_1 = arith.constant 0 : i32
    return %c0_i32, %c0_i32_0 : i32, i32
  }
  func.func @transform_5(%arg0: i32) -> (i32, i32) {
    %c0_i32 = arith.constant 0 : i32
    %c0_i32_0 = arith.constant 0 : i32
    return %c0_i32, %arg0 : i32, i32
  }
}

module attributes {stable_mosaic.version = 11 : i64} {
  func.func @_conv_kernel(%arg0: i32, %arg1: memref<800x256xbf16, #tpu.memory_space<vmem>>, %arg2: memref<8x800xbf16, #tpu.memory_space<vmem>>, %arg3: memref<8x1xf32, #tpu.memory_space<vmem>>, %arg4: memref<8x256xf32, #tpu.memory_space<vmem>>) attributes {dimension_semantics = [#tpu.dimension_semantics<parallel>], iteration_bounds = array<i64: 2>, scalar_prefetch = 0 : i64, scratch_operands = 0 : i64, tpu.core_type = #tpu.core_type<tc>, window_params = [{transform_indices = @transform_0, window_bounds = array<i64: 800, 256>}, {pipeline_mode = #tpu.pipeline_mode<synchronous>, transform_indices = @transform_1, window_bounds = array<i64: 8, 800>}, {pipeline_mode = #tpu.pipeline_mode<synchronous>, transform_indices = @transform_2, window_bounds = array<i64: 8, 1>}, {transform_indices = @transform_3, window_bounds = array<i64: 8, 256>}]} {
    %c0 = arith.constant 0 : index
    %c0_0 = arith.constant 0 : index
    %0 = vector.load %arg2[%c0, %c0_0] : memref<8x800xbf16, #tpu.memory_space<vmem>>, vector<8x800xbf16>
    %c0_1 = arith.constant 0 : index
    %c0_2 = arith.constant 0 : index
    %1 = vector.load %arg1[%c0_1, %c0_2] : memref<800x256xbf16, #tpu.memory_space<vmem>>, vector<800x256xbf16>
    %cst = arith.constant dense<0.000000e+00> : vector<8x256xf32>
    %2 = tpu.matmul %0, %1, %cst {dimension_numbers = #tpu.dot_dimension_numbers<[1], [0], [0], [1], [0, 0, 1, 1], [], []>} : vector<8x800xbf16>, vector<800x256xbf16>, vector<8x256xf32> -> vector<8x256xf32>
    %c0_3 = arith.constant 0 : index
    %c0_4 = arith.constant 0 : index
    %3 = vector.load %arg3[%c0_3, %c0_4] : memref<8x1xf32, #tpu.memory_space<vmem>>, vector<8x1xf32>
    %4 = vector.broadcast %3 : vector<8x1xf32> to vector<8x256xf32>
    %5 = arith.addf %2, %4 : vector<8x256xf32>
    %c0_5 = arith.constant 0 : index
    %c0_6 = arith.constant 0 : index
    %6 = vector.load %arg4[%c0_5, %c0_6] : memref<8x256xf32, #tpu.memory_space<vmem>>, vector<8x256xf32>
    tpu.vector_store %arg4[%c0_5, %c0_6], %5 {strides = array<i32>} : memref<8x256xf32, #tpu.memory_space<vmem>>, vector<8x256xf32>,
    return
  }
  func.func @transform_0(%arg0: i32) -> (i32, i32) {
    %c0_i32 = arith.constant 0 : i32
    %c0_i32_0 = arith.constant 0 : i32
    return %c0_i32, %arg0 : i32, i32
  }
  func.func @transform_1(%arg0: i32) -> (i32, i32) {
    %c0_i32 = arith.constant 0 : i32
    %c0_i32_0 = arith.constant 0 : i32
    %c0_i32_1 = arith.constant 0 : i32
    return %c0_i32, %c0_i32_0 : i32, i32
  }
  func.func @transform_2(%arg0: i32) -> (i32, i32) {
    %c0_i32 = arith.constant 0 : i32
    %c0_i32_0 = arith.constant 0 : i32
    %c0_i32_1 = arith.constant 0 : i32
    return %c0_i32, %c0_i32_0 : i32, i32
  }
  func.func @transform_3(%arg0: i32) -> (i32, i32) {
    %c0_i32 = arith.constant 0 : i32
    %c0_i32_0 = arith.constant 0 : i32
    return %c0_i32, %arg0 : i32, i32
  }
}

</mosaic_0001>

<bundles_post_ra>
// kernel: deblur_cnn_forward.2
= control target key start
LH: loop header
LB: loop body
LE: loop exit
PB: predicated region body
PF: predicated region fallthrough
CT: control target
= control target key end

     0   :  { %s1223_s18 = smov 0   ;;  %s1225_s19 = smov 0   ;;  %s1459_s0 = inlined_call_operand.vmem [shape: bf16[256,512], index: 0, kind: input, shape index: {}]   ;;  %s1460_s1 = inlined_call_operand.vmem [shape: bf16[64,256], index: 1, kind: input, shape index: {}]   ;;  %s1461_s2 = inlined_call_operand.vmem [shape: f32[64,1], index: 2, kind: input, shape index: {}]   ;;  %s1462_s3 = inlined_call_operand.vmem [shape: bf16[32,64], index: 3, kind: input, shape index: {}]   ;;  %s1463_s4 = inlined_call_operand.vmem [shape: f32[32,1], index: 4, kind: input, shape index: {}]   ;;  %s1464_s5 = inlined_call_operand.vmem [shape: bf16[32,512], index: 5, kind: output, shape index: {}]  }
   0x1   :  { %s1227_s20 = smov 0  }
   0x2 LB: > { %s1010_s21 = sadd.s32 4294967295, %s1190_s20   ;;  %s1240_s22 = sadd.s32 1, %s1190_s20   ;;  %s1190_s20 = sphi %s1227_s20, %s1468_s20   ;;  %s1186_s19 = sphi %s1225_s19, %s1467_s19   ;;  %s1182_s18 = sphi %s1223_s18, %s1466_s18  }
   0x3   : > { %s19_s23 = ssub.s32 %s1190_s20, %s1240_s22  ;;  %s22_s24 = sadd.s32 1, %s1186_s19 }
   0x4   : > { %p20_p0 = scmp.eq.s32.totalorder %s19_s23, 0  ;;  %p29_p1 = scmp.ne.s32.totalorder %s1186_s19, %s1182_s18 }
   0x5   : > { %p30_p2 = scmp.eq.s32.totalorder %s1190_s20, 0  ;;  %p143_p3 = scmp.eq.s32.totalorder %s1010_s21, 1 }
   0x6   : > { %s1251_s25 = scalar_select %p20_p0, %s1186_s19, %s22_s24  }
   0x7   : > { %p31_p4 = por %p30_p2, %p29_p1  ;;  %p1253_p5 = por %p143_p3, %p29_p1 }
   0x8   : > { %p1013_p6 = scmp.ge.s32.totalorder %s1190_s20, 2 }
   0xa   : > { %177 = sbr.rel (%p1013_p6) target bundleno = 37 (0x25), region = 32 }
  0x11   : > { %180 = sbr.rel (!%p31_p4) target bundleno = 37 (0x25), region = 36  ;;  %s182_s27 = sand.u32 (%p31_p4), 1, %s1186_s19  }
  0x12   : > { %s1073_s28 = sshll.u32 (%p31_p4), %s1190_s20, 3  ;;  %s1014_s29 = sshll.u32 (%p31_p4), %s182_s27, 8 }
  0x13   : > { %s1263_s7 = scalar_lea.vmem (%p31_p4), %s1459_s0, %s1073_s28  ;;  %s1268_s8 = scalar_lea.vmem (%p31_p4), [#allocation2], %s1014_s29 }
  0x14   : > { %v277_v0 = vld [vmem:[%s1263_s7] sm:$0xff] (%p31_p4)  ;;  %v279_v1 = vld [vmem:[%s1263_s7 + $0x10] sm:$0xff] (%p31_p4) }
  0x15   : > { %v281_v2 = vld [vmem:[%s1263_s7 + $0x20] sm:$0xff] (%p31_p4)  ;;  %278 = vst [vmem:[%s1268_s8] sm:$0xff] (%p31_p4), %v277_v0  ;;  %280 = vst [vmem:[%s1268_s8 + $0x8] sm:$0xff] (%p31_p4), %v279_v1  ;;  %v283_v3 = vld [vmem:[%s1263_s7 + $0x30] sm:$0xff] (%p31_p4) }
  0x16   : > { %282 = vst [vmem:[%s1268_s8 + $0x10] sm:$0xff] (%p31_p4), %v281_v2  ;;  %v285_v4 = vld [vmem:[%s1263_s7 + $0x40] sm:$0xff] (%p31_p4)  ;;  %v287_v5 = vld [vmem:[%s1263_s7 + $0x50] sm:$0xff] (%p31_p4)  ;;  %284 = vst [vmem:[%s1268_s8 + $0x18] sm:$0xff] (%p31_p4), %v283_v3 }
  0x17   : > { %286 = vst [vmem:[%s1268_s8 + $0x20] sm:$0xff] (%p31_p4), %v285_v4  ;;  %288 = vst [vmem:[%s1268_s8 + $0x28] sm:$0xff] (%p31_p4), %v287_v5  ;;  %v289_v6 = vld [vmem:[%s1263_s7 + $0x60] sm:$0xff] (%p31_p4)  ;;  %v291_v7 = vld [vmem:[%s1263_s7 + $0x70] sm:$0xff] (%p31_p4) }
  0x18   : > { %v293_v8 = vld [vmem:[%s1263_s7 + $0x80] sm:$0xff]  ;;  %290 = vst [vmem:[%s1268_s8 + $0x30] sm:$0xff] %v289_v6  ;;  %292 = vst [vmem:[%s1268_s8 + $0x38] sm:$0xff] %v291_v7  ;;  %v295_v9 = vld [vmem:[%s1263_s7 + $0x90] sm:$0xff] }
  0x19   : > { %294 = vst [vmem:[%s1268_s8 + $0x40] sm:$0xff] %v293_v8  ;;  %v297_v10 = vld [vmem:[%s1263_s7 + $0xa0] sm:$0xff]  ;;  %v299_v11 = vld [vmem:[%s1263_s7 + $0xb0] sm:$0xff]  ;;  %296 = vst [vmem:[%s1268_s8 + $0x48] sm:$0xff] %v295_v9 }
  0x1a   : > { %298 = vst [vmem:[%s1268_s8 + $0x50] sm:$0xff] %v297_v10  ;;  %300 = vst [vmem:[%s1268_s8 + $0x58] sm:$0xff] %v299_v11  ;;  %v301_v12 = vld [vmem:[%s1263_s7 + $0xc0] sm:$0xff]  ;;  %v303_v13 = vld [vmem:[%s1263_s7 + $0xd0] sm:$0xff] }
  0x1b   : > { %v305_v14 = vld [vmem:[%s1263_s7 + $0xe0] sm:$0xff]  ;;  %302 = vst [vmem:[%s1268_s8 + $0x60] sm:$0xff] %v301_v12  ;;  %304 = vst [vmem:[%s1268_s8 + $0x68] sm:$0xff] %v303_v13  ;;  %v307_v15 = vld [vmem:[%s1263_s7 + $0xf0] sm:$0xff] }
  0x1c   : > { %306 = vst [vmem:[%s1268_s8 + $0x70] sm:$0xff] %v305_v14  ;;  %v309_v16 = vld [vmem:[%s1263_s7 + $0x100] sm:$0xff]  ;;  %v311_v17 = vld [vmem:[%s1263_s7 + $0x110] sm:$0xff]  ;;  %308 = vst [vmem:[%s1268_s8 + $0x78] sm:$0xff] %v307_v15 }
  0x1d   : > { %310 = vst [vmem:[%s1268_s8 + $0x80] sm:$0xff] %v309_v16  ;;  %312 = vst [vmem:[%s1268_s8 + $0x88] sm:$0xff] %v311_v17  ;;  %v313_v18 = vld [vmem:[%s1263_s7 + $0x120] sm:$0xff]  ;;  %v315_v19 = vld [vmem:[%s1263_s7 + $0x130] sm:$0xff] }
  0x1e   : > { %v317_v20 = vld [vmem:[%s1263_s7 + $0x140] sm:$0xff]  ;;  %314 = vst [vmem:[%s1268_s8 + $0x90] sm:$0xff] %v313_v18  ;;  %316 = vst [vmem:[%s1268_s8 + $0x98] sm:$0xff] %v315_v19  ;;  %v319_v21 = vld [vmem:[%s1263_s7 + $0x150] sm:$0xff] }
  0x1f   : > { %318 = vst [vmem:[%s1268_s8 + $0xa0] sm:$0xff] %v317_v20  ;;  %v321_v22 = vld [vmem:[%s1263_s7 + $0x160] sm:$0xff]  ;;  %v323_v23 = vld [vmem:[%s1263_s7 + $0x170] sm:$0xff]  ;;  %320 = vst [vmem:[%s1268_s8 + $0xa8] sm:$0xff] %v319_v21 }
  0x20   : > { %322 = vst [vmem:[%s1268_s8 + $0xb0] sm:$0xff] %v321_v22  ;;  %324 = vst [vmem:[%s1268_s8 + $0xb8] sm:$0xff] %v323_v23  ;;  %v325_v24 = vld [vmem:[%s1263_s7 + $0x180] sm:$0xff]  ;;  %v327_v25 = vld [vmem:[%s1263_s7 + $0x190] sm:$0xff] }
  0x21   : > { %v329_v26 = vld [vmem:[%s1263_s7 + $0x1a0] sm:$0xff]  ;;  %326 = vst [vmem:[%s1268_s8 + $0xc0] sm:$0xff] %v325_v24  ;;  %328 = vst [vmem:[%s1268_s8 + $0xc8] sm:$0xff] %v327_v25  ;;  %v331_v27 = vld [vmem:[%s1263_s7 + $0x1b0] sm:$0xff] }
  0x22   : > { %330 = vst [vmem:[%s1268_s8 + $0xd0] sm:$0xff] %v329_v26  ;;  %v333_v28 = vld [vmem:[%s1263_s7 + $0x1c0] sm:$0xff]  ;;  %v335_v29 = vld [vmem:[%s1263_s7 + $0x1d0] sm:$0xff]  ;;  %332 = vst [vmem:[%s1268_s8 + $0xd8] sm:$0xff] %v331_v27 }
  0x23   : > { %334 = vst [vmem:[%s1268_s8 + $0xe0] sm:$0xff] %v333_v28  ;;  %336 = vst [vmem:[%s1268_s8 + $0xe8] sm:$0xff] %v335_v29  ;;  %v337_v30 = vld [vmem:[%s1263_s7 + $0x1e0] sm:$0xff]  ;;  %v339_v31 = vld [vmem:[%s1263_s7 + $0x1f0] sm:$0xff] }
  0x24   : > { %338 = vst [vmem:[%s1268_s8 + $0xf0] sm:$0xff] %v337_v30  ;;  %340 = vst [vmem:[%s1268_s8 + $0xf8] sm:$0xff] %v339_v31 }
  0x25 PF: > { %p1017_p7 = scmp.ge.s32.totalorder %s1190_s20, 1  ;;  %p345_p8 = scmp.lt.s32.totalorder %s1190_s20, 3 }
  0x27   : > { %p346_p9 = pnand %p1017_p7, %p345_p8 }
  0x28   : > { %s352_s9 = sand.u32 (!%p346_p9), 1, %s1182_s18   ;;  %v1156_v32 = vld [vmem:[%s1460_s1 + $0x4] ss:$8 sps:$4 sm:$0xff] (!%p346_p9)   ;;  %v1192_v33 = vmov (!%p346_p9), 0   ;;  %v423_v50 = vld [vmem:[%s1461_s2 + $0x10] sm:$0xff] (!%p346_p9)  ;;  %v424_v52 = vld [vmem:[%s1461_s2 + $0x18] sm:$0xff] (!%p346_p9) }
  0x29   : > { %349 = sbr.rel (%p346_p9) target bundleno = 595 (0x253), region = 74  ;;  %s1018_s10 = sshll.u32 (!%p346_p9), %s352_s9, 8  ;;  %1104 = vset.pattern.permute.xlu0 (!%p346_p9), %v1192_v33  ;;  %1105 = vset.pattern.permute.xlu1 (!%p346_p9), %v1192_v33  ;;  %v421_v48 = vld [vmem:[%s1461_s2] sm:$0xff] (!%p346_p9)  ;;  %v422_v51 = vld [vmem:[%s1461_s2 + $0x8] sm:$0xff] (!%p346_p9)  ;;  %v427_v59 = vld [vmem:[%s1461_s2 + $0x30] sm:$0xff] (!%p346_p9)  ;;  %vm804_vm0 = vcmask (!%p346_p9), 523264  }
  0x2a   : > { %843 = vmatprep.mubr.bf16.mxu1 (!%p346_p9), %v1192_v33  ;;  %s1342_s13 = scalar_lea.vmem (!%p346_p9), [#allocation2], %s1018_s10  ;;  %701 = vmatprep.mubr.bf16.mxu0 (!%p346_p9), %v1156_v32  ;;  %v425_v55 = vld [vmem:[%s1461_s2 + $0x20] sm:$0xff] (!%p346_p9)  ;;  %v426_v56 = vld [vmem:[%s1461_s2 + $0x28] sm:$0xff] (!%p346_p9)  ;;  %v428_v60 = vld [vmem:[%s1461_s2 + $0x38] sm:$0xff] (!%p346_p9)  ;;  %s1019_s30 = sshll.u32 (!%p346_p9), %s352_s9, 5 }
  0x2b   : > { %v1106_v34 = vld [vmem:[%s1342_s13 + $0x4] ss:$8 sps:$4 sm:$0xff] (!%p346_p9)   ;;  %v1108_v35 = vld [vmem:[%s1342_s13] ss:$8 sps:$4 sm:$0xff] (!%p346_p9)   ;;  %v1109_v36 = vld [vmem:[%s1342_s13 + $0x14] ss:$8 sps:$4 sm:$0xff] (!%p346_p9)   ;;  %431 = vperm.xlu0 (!%p346_p9), %1104, %v421_v48   ;;  %441 = vperm.xlu1 (!%p346_p9), %1105, %v423_v50  }
  0x2c   : > { %669 = vmatprep.subr.bf16.mxu0 (!%p346_p9), %v1106_v34  ;;  %v1111_v37 = vld [vmem:[%s1342_s13 + $0x10] ss:$8 sps:$4 sm:$0xff] (!%p346_p9)   ;;  %v1112_v38 = vld [vmem:[%s1342_s13 + $0x24] ss:$8 sps:$4 sm:$0xff] (!%p346_p9)   ;;  %v1114_v39 = vld [vmem:[%s1342_s13 + $0x20] ss:$8 sps:$4 sm:$0xff] (!%p346_p9)  }
  0x2d   : > { %670 = vmatpush1.bf16.msra.mxu0 (!%p346_p9), %v1108_v35  ;;  %v1115_v40 = vld [vmem:[%s1342_s13 + $0x34] ss:$8 sps:$4 sm:$0xff] (!%p346_p9)   ;;  %v1117_v41 = vld [vmem:[%s1342_s13 + $0x30] ss:$8 sps:$4 sm:$0xff] (!%p346_p9)   ;;  %v1118_v42 = vld [vmem:[%s1342_s13 + $0x44] ss:$8 sps:$4 sm:$0xff] (!%p346_p9)  }
  0x2e   : > { %671 = vmatprep.subr.bf16.mxu0 (!%p346_p9), %v1109_v36  ;;  %v1120_v43 = vld [vmem:[%s1342_s13 + $0x40] ss:$8 sps:$4 sm:$0xff] (!%p346_p9)   ;;  %v1121_v44 = vld [vmem:[%s1342_s13 + $0x54] ss:$8 sps:$4 sm:$0xff] (!%p346_p9)   ;;  %v1123_v45 = vld [vmem:[%s1342_s13 + $0x50] ss:$8 sps:$4 sm:$0xff] (!%p346_p9)  }
  0x2f   : > { %v1124_v46 = vld [vmem:[%s1342_s13 + $0x64] ss:$8 sps:$4 sm:$0xff] (!%p346_p9)   ;;  %v1126_v47 = vld [vmem:[%s1342_s13 + $0x60] ss:$8 sps:$4 sm:$0xff] (!%p346_p9)   ;;  %v1127_v49 = vld [vmem:[%s1342_s13 + $0x74] ss:$8 sps:$4 sm:$0xff] (!%p346_p9)   ;;  %436 = vperm.xlu0 (!%p346_p9), %1104, %v422_v51   ;;  %446 = vperm.xlu1 (!%p346_p9), %1105, %v424_v52  }
  0x30   : > { %v1129_v53 = vld [vmem:[%s1342_s13 + $0x70] ss:$8 sps:$4 sm:$0xff]   ;;  %v1130_v54 = vld [vmem:[%s1342_s13 + $0x84] ss:$8 sps:$4 sm:$0xff]   ;;  %v1132_v57 = vld [vmem:[%s1342_s13 + $0x80] ss:$8 sps:$4 sm:$0xff]  }
  0x31   : > { %672 = vmatpush1.bf16.msra.mxu0 %v1111_v37  ;;  %v1133_v58 = vld [vmem:[%s1342_s13 + $0x94] ss:$8 sps:$4 sm:$0xff]   ;;  %v1135_v61 = vld [vmem:[%s1342_s13 + $0x90] ss:$8 sps:$4 sm:$0xff]   ;;  %v1136_v62 = vld [vmem:[%s1342_s13 + $0xa4] ss:$8 sps:$4 sm:$0xff]  }
  0x32   : > { %673 = vmatprep.subr.bf16.mxu0 %v1112_v38  ;;  %v770_v63 = vld [vmem:[%s1463_s4] sm:$0xff]  ;;  %v771_v0 = vld [vmem:[%s1463_s4 + $0x8] sm:$0xff]  ;;  %v1139_v2 = vld [vmem:[%s1342_s13 + $0xb4] ss:$8 sps:$4 sm:$0xff]   ;;  %s377_s6 = scalar_lea.vmem [#allocation3], %s1019_s30  ;;  %s1078_s18 = sshll.u32 (%p1253_p5), %s1010_s21, 3 }
  0x33   : > { %451 = vperm.xlu0 %1104, %v425_v55   ;;  %456 = vperm.xlu1 %1105, %v426_v56   ;;  %v1138_v1 = vld [vmem:[%s1342_s13 + $0xa0] ss:$8 sps:$4 sm:$0xff]   ;;  %v772_v3 = vld [vmem:[%s1463_s4 + $0x10] sm:$0xff]  ;;  %v773_v4 = vld [vmem:[%s1463_s4 + $0x18] sm:$0xff]  ;;  %s909_s8 = scalar_lea.vmem (%p1253_p5), %s1464_s5, %s1078_s18 }
  0x34   : > { %v1141_v5 = vld [vmem:[%s1342_s13 + $0xb0] ss:$8 sps:$4 sm:$0xff]   ;;  %v1142_v6 = vld [vmem:[%s1342_s13 + $0xc4] ss:$8 sps:$4 sm:$0xff]   ;;  %v1144_v7 = vld [vmem:[%s1342_s13 + $0xc0] ss:$8 sps:$4 sm:$0xff]  }
  0x35   : > { %674 = vmatpush1.bf16.msra.mxu0 %v1114_v39  ;;  %v1145_v8 = vld [vmem:[%s1342_s13 + $0xd4] ss:$8 sps:$4 sm:$0xff]   ;;  %v1147_v9 = vld [vmem:[%s1342_s13 + $0xd0] ss:$8 sps:$4 sm:$0xff]   ;;  %v1148_v10 = vld [vmem:[%s1342_s13 + $0xe4] ss:$8 sps:$4 sm:$0xff]  }
  0x36   : > { %675 = vmatprep.subr.bf16.mxu0 %v1115_v40  ;;  %v1150_v11 = vld [vmem:[%s1342_s13 + $0xe0] ss:$8 sps:$4 sm:$0xff]   ;;  %v1151_v12 = vld [vmem:[%s1342_s13 + $0xf4] ss:$8 sps:$4 sm:$0xff]   ;;  %v1153_v13 = vld [vmem:[%s1342_s13 + $0xf0] ss:$8 sps:$4 sm:$0xff]  }
  0x37   : > { %461 = vperm.xlu0 %1104, %v427_v59   ;;  %466 = vperm.xlu1 %1105, %v428_v60   ;;  %v1154_v14 = vld [vmem:[%s1460_s1] ss:$8 sps:$4 sm:$0xff]   ;;  %v1157_v15 = vld [vmem:[%s1460_s1 + $0x14] ss:$8 sps:$4 sm:$0xff]   ;;  %v1159_v16 = vld [vmem:[%s1460_s1 + $0x10] ss:$8 sps:$4 sm:$0xff]  }
  0x38   : > { %v1160_v17 = vld [vmem:[%s1460_s1 + $0x24] ss:$8 sps:$4 sm:$0xff]   ;;  %v1162_v18 = vld [vmem:[%s1460_s1 + $0x20] ss:$8 sps:$4 sm:$0xff]   ;;  %v1163_v19 = vld [vmem:[%s1460_s1 + $0x34] ss:$8 sps:$4 sm:$0xff]  }
  0x39   : > { %676 = vmatpush1.bf16.msra.mxu0 %v1117_v41  ;;  %v1165_v20 = vld [vmem:[%s1460_s1 + $0x30] ss:$8 sps:$4 sm:$0xff]  }
  0x3a   : > { %677 = vmatprep.subr.bf16.mxu0 %v1118_v42 }
  0x3b   : > { %776 = vperm.xlu0 %1104, %v770_v63   ;;  %781 = vperm.xlu1 %1105, %v771_v0  }
  0x3d   : > { %678 = vmatpush1.bf16.msra.mxu0 %v1120_v43 }
  0x3e   : > { %679 = vmatprep.subr.bf16.mxu0 %v1121_v44 }
  0x3f   : > { %786 = vperm.xlu0 %1104, %v772_v3   ;;  %791 = vperm.xlu1 %1105, %v773_v4  }
  0x41   : > { %680 = vmatpush1.bf16.msra.mxu0 %v1123_v45 }
  0x42   : > { %681 = vmatprep.subr.bf16.mxu0 %v1124_v46 }
  0x45   : > { %682 = vmatpush1.bf16.msra.mxu0 %v1126_v47 }
  0x46   : > { %683 = vmatprep.subr.bf16.mxu0 %v1127_v49 }
  0x49   : > { %684 = vmatpush1.bf16.msra.mxu0 %v1129_v53 }
  0x4a   : > { %685 = vmatprep.subr.bf16.mxu0 %v1130_v54 }
  0x4d   : > { %686 = vmatpush1.bf16.msra.mxu0 %v1132_v57 }
  0x4e   : > { %687 = vmatprep.subr.bf16.mxu0 %v1133_v58 }
  0x51   : > { %688 = vmatpush1.bf16.msra.mxu0 %v1135_v61 }
  0x52   : > { %689 = vmatprep.subr.bf16.mxu0 %v1136_v62 }
  0x55   : > { %690 = vmatpush1.bf16.msra.mxu0 %v1138_v1 }
  0x56   : > { %691 = vmatprep.subr.bf16.mxu0 %v1139_v2 }
  0x59   : > { %692 = vmatpush1.bf16.msra.mxu0 %v1141_v5 }
  0x5a   : > { %693 = vmatprep.subr.bf16.mxu0 %v1142_v6 }
  0x5d   : > { %694 = vmatpush1.bf16.msra.mxu0 %v1144_v7 }
  0x5e   : > { %695 = vmatprep.subr.bf16.mxu0 %v1145_v8 }
  0x61   : > { %696 = vmatpush1.bf16.msra.mxu0 %v1147_v9 }
  0x62   : > { %697 = vmatprep.subr.bf16.mxu0 %v1148_v10 }
  0x65   : > { %698 = vmatpush1.bf16.msra.mxu0 %v1150_v11 }
  0x66   : > { %699 = vmatprep.subr.bf16.mxu0 %v1151_v12 }
  0x69   : > { %700 = vmatpush1.bf16.msra.mxu0 %v1153_v13 }
  0x6c   : > { %702 = vmatmul.mubr.bf16.vlgmr.msra.gmra.mrb[0].mxu0 %v1154_v14 }
  0x6d   : > { %711 = vmatprep.mubr.bf16.mxu0 %v1157_v15 }
  0x74   : > { %712 = vmatmul.mubr.bf16.gmra.mrb[4].mxu0 %v1159_v16 }
  0x75   : > { %721 = vmatprep.mubr.bf16.mxu0 %v1160_v17 }
  0x7c   : > { %722 = vmatmul.mubr.bf16.gmra.mrb[8].mxu0 %v1162_v18 }
  0x7d   : > { %731 = vmatprep.mubr.bf16.mxu0 %v1163_v19 }
  0x84   : > { %732 = vmatmul.mubr.bf16.gmra.mrb[12].mxu0 %v1165_v20 }
  0xaa   : > { %v432_v21 = vpop.permute.xlu0 %431  ;;  %v442_v30 = vpop.permute.xlu1 %441 }
  0xae   : > { %v437_v25 = vpop.permute.xlu0 %436  ;;  %v447_v42 = vpop.permute.xlu1 %446 }
  0xb2   : > { %v452_v53 = vpop.permute.xlu0 %451  ;;  %v457_v58 = vpop.permute.xlu1 %456 }
  0xb6   : > { %v462_v5 = vpop.permute.xlu0 %461  ;;  %v467_v10 = vpop.permute.xlu1 %466 }
 0x13f   : > { %v703_v22 = vpop.f32.mrb[0].mxu0 }
 0x140   : > { %v704_v23 = vadd.f32 %v703_v22, %v432_v21  ;;  %v705_v24 = vpop.f32.mrb[1].mxu0  ;;  %v1166_v22 = vld [vmem:[%s1462_s3] sm:$0xff]  }
 0x141   : > { %v706_v26 = vadd.f32 %v705_v24, %v432_v21  ;;  %v707_v27 = vpop.f32.mrb[2].mxu0  ;;  %v777_v24 = vpop.permute.xlu0 %776 }
 0x142   : > { %v708_v28 = vadd.f32 %v707_v27, %v437_v25  ;;  %v709_v29 = vpop.f32.mrb[3].mxu0  ;;  %v742_v32 = vmax.f32 %v704_v23, 0.0  ;;  %v1167_v23 = vld [vmem:[%s1462_s3 + $0x8] sm:$0xff]  }
 0x143   : > { %v710_v31 = vadd.f32 %v709_v29, %v437_v25  ;;  %v743_v35 = vmax.f32 %v706_v26, 0.0 }
 0x144   : > { %v744_v34 = vmax.f32 %v708_v28, 0.0  ;;  %v782_v28 = vpop.permute.xlu1 %781 }
 0x145   : > { %v745_v36 = vmax.f32 %v710_v31, 0.0 }
 0x146   : > { %v762_v37 = vpack.c.bf16 %v744_v34, %v742_v32 }
 0x147   : > { %v713_v38 = vpop.f32.mrb[4].mxu0  ;;  %v763_v39 = vpack.c.bf16 %v745_v36, %v743_v35 }
 0x148   : > { %v714_v40 = vadd.f32 %v713_v38, %v442_v30  ;;  %v715_v41 = vpop.f32.mrb[5].mxu0 }
 0x149   : > { %v716_v43 = vadd.f32 %v715_v41, %v442_v30  ;;  %v717_v44 = vpop.f32.mrb[6].mxu0  ;;  %811 = vmatprep.subr.bf16.mxu1 %v763_v39  ;;  %v787_v39 = vpop.permute.xlu0 %786 }
 0x14a   : > { %v718_v45 = vadd.f32 %v717_v44, %v447_v42  ;;  %v719_v46 = vpop.f32.mrb[7].mxu0  ;;  %812 = vmatpush1.bf16.msra.mxu1 %v762_v37  ;;  %v746_v48 = vmax.f32 %v714_v40, 0.0  ;;  %v792_v44 = vpop.permute.xlu1 %791 }
 0x14b   : > { %v720_v47 = vadd.f32 %v719_v46, %v447_v42  ;;  %v747_v50 = vmax.f32 %v716_v43, 0.0 }
 0x14c   : > { %v748_v49 = vmax.f32 %v718_v45, 0.0 }
 0x14d   : > { %v749_v51 = vmax.f32 %v720_v47, 0.0 }
 0x14e   : > { %v764_v52 = vpack.c.bf16 %v748_v49, %v746_v48 }
 0x14f   : > { %v765_v54 = vpack.c.bf16 %v749_v51, %v747_v50  ;;  %v723_v55 = vpop.f32.mrb[8].mxu0 }
 0x150   : > { %v724_v56 = vadd.f32 %v723_v55, %v452_v53  ;;  %v725_v57 = vpop.f32.mrb[9].mxu0 }
 0x151   : > { %v726_v59 = vadd.f32 %v725_v57, %v452_v53  ;;  %v727_v60 = vpop.f32.mrb[10].mxu0  ;;  %813 = vmatprep.subr.bf16.mxu1 %v765_v54 }
 0x152   : > { %v728_v61 = vadd.f32 %v727_v60, %v457_v58  ;;  %v729_v62 = vpop.f32.mrb[11].mxu0  ;;  %814 = vmatpush1.bf16.msra.mxu1 %v764_v52  ;;  %v750_v0 = vmax.f32 %v724_v56, 0.0 }
 0x153   : > { %v730_v63 = vadd.f32 %v729_v62, %v457_v58  ;;  %v751_v2 = vmax.f32 %v726_v59, 0.0 }
 0x154   : > { %v752_v1 = vmax.f32 %v728_v61, 0.0 }
 0x155   : > { %v753_v3 = vmax.f32 %v730_v63, 0.0 }
 0x156   : > { %v766_v4 = vpack.c.bf16 %v752_v1, %v750_v0 }
 0x157   : > { %v767_v6 = vpack.c.bf16 %v753_v3, %v751_v2  ;;  %v733_v7 = vpop.f32.mrb[12].mxu0 }
 0x158   : > { %v734_v8 = vadd.f32 %v733_v7, %v462_v5  ;;  %v735_v9 = vpop.f32.mrb[13].mxu0 }
 0x159   : > { %v736_v11 = vadd.f32 %v735_v9, %v462_v5  ;;  %v737_v12 = vpop.f32.mrb[14].mxu0  ;;  %815 = vmatprep.subr.bf16.mxu1 %v767_v6 }
 0x15a   : > { %v738_v13 = vadd.f32 %v737_v12, %v467_v10  ;;  %v739_v14 = vpop.f32.mrb[15].mxu0  ;;  %816 = vmatpush1.bf16.msra.mxu1 %v766_v4  ;;  %v754_v16 = vmax.f32 %v734_v8, 0.0 }
 0x15b   : > { %v740_v15 = vadd.f32 %v739_v14, %v467_v10  ;;  %v755_v18 = vmax.f32 %v736_v11, 0.0 }
 0x15c   : > { %v756_v17 = vmax.f32 %v738_v13, 0.0 }
 0x15d   : > { %v757_v19 = vmax.f32 %v740_v15, 0.0 }
 0x15e   : > { %v768_v20 = vpack.c.bf16 %v756_v17, %v754_v16 }
 0x15f   : > { %v769_v21 = vpack.c.bf16 %v757_v19, %v755_v18 }
 0x161   : > { %817 = vmatprep.subr.bf16.mxu1 %v769_v21 }
 0x162   : > { %818 = vmatpush1.bf16.msra.mxu1 %v768_v20 }
 0x165   : > { %1062 = vmatmul.mubr.msk.bf16.vlgmr.msra.gmra.mrb[0].mxu1 %vm804_vm0, %v1166_v22 }
 0x166   : > { %853 = vmatprep.mubr.bf16.mxu1 %v1192_v33 }
 0x16d   : > { %1063 = vmatmul.mubr.msk.bf16.gmra.mrb[4].mxu1 %vm804_vm0, %v1167_v23 }
 0x238   : > { %v845_v25 = vpop.f32.mrb[0].mxu1 }
 0x239   : > { %v846_v26 = vadd.f32 %v845_v25, %v777_v24  ;;  %v847_v27 = vpop.f32.mrb[1].mxu1 }
 0x23a   : > { %v848_v29 = vadd.f32 %v847_v27, %v777_v24  ;;  %v849_v30 = vpop.f32.mrb[2].mxu1 }
 0x23b   : > { %v864_v31 = vmax.f32 %v846_v26, 0.0  ;;  %v850_v32 = vadd.f32 %v849_v30, %v782_v28  ;;  %v851_v34 = vpop.f32.mrb[3].mxu1 }
 0x23c   : > { %v865_v35 = vmax.f32 %v848_v29, 0.0  ;;  %v852_v36 = vadd.f32 %v851_v34, %v782_v28 }
 0x23d   : > { %v866_v33 = vmax.f32 %v850_v32, 0.0 }
 0x23e   : > { %v1074_v37 = vpack.c.bf16 %v865_v35, %v864_v31  ;;  %v867_v38 = vmax.f32 %v852_v36, 0.0 }
 0x240   : > { %896 = vst [vmem:[%s377_s6] sm:$0xff] %v1074_v37  ;;  %v1075_v40 = vpack.c.bf16 %v867_v38, %v866_v33  ;;  %v855_v41 = vpop.f32.mrb[4].mxu1 }
 0x241   : > { %v856_v42 = vadd.f32 %v855_v41, %v787_v39  ;;  %v857_v43 = vpop.f32.mrb[5].mxu1 }
 0x242   : > { %897 = vst [vmem:[%s377_s6 + $0x8] sm:$0xff] %v1075_v40  ;;  %v858_v45 = vadd.f32 %v857_v43, %v787_v39  ;;  %v859_v46 = vpop.f32.mrb[6].mxu1 }
 0x243   : > { %v868_v47 = vmax.f32 %v856_v42, 0.0  ;;  %v860_v48 = vadd.f32 %v859_v46, %v792_v44  ;;  %v861_v49 = vpop.f32.mrb[7].mxu1 }
 0x244   : > { %v869_v50 = vmax.f32 %v858_v45, 0.0  ;;  %v862_v51 = vadd.f32 %v861_v49, %v792_v44  ;;  %906 = sbr.rel (!%p1253_p5) target bundleno = 595 (0x253), region = 82 }
 0x245   : > { %v870_v52 = vmax.f32 %v860_v48, 0.0 }
 0x246   : > { %v1076_v53 = vpack.c.bf16 %v869_v50, %v868_v47  ;;  %v871_v54 = vmax.f32 %v862_v51, 0.0 }
 0x247   : > { %v943_v56 = vld [vmem:[%s377_s6] sm:$0xff] (%p1253_p5) }
 0x248   : > { %898 = vst [vmem:[%s377_s6 + $0x10] sm:$0xff] %v1076_v53  ;;  %v1077_v55 = vpack.c.bf16 %v871_v54, %v870_v52  ;;  %944 = vst [vmem:[%s909_s8] sm:$0xff] (%p1253_p5), %v943_v56 }
 0x249   : > { %v945_v57 = vld [vmem:[%s377_s6 + $0x8] sm:$0xff] (%p1253_p5) }
 0x24a   : > { %899 = vst [vmem:[%s377_s6 + $0x18] sm:$0xff] %v1077_v55  ;;  %946 = vst [vmem:[%s909_s8 + $0x10] sm:$0xff] (%p1253_p5), %v945_v57 }
 0x24f   : > { %v947_v58 = vld [vmem:[%s377_s6 + $0x10] sm:$0xff] }
 0x250   : > { %948 = vst [vmem:[%s909_s8 + $0x20] sm:$0xff] %v947_v58 }
 0x251   : > { %v949_v59 = vld [vmem:[%s377_s6 + $0x18] sm:$0xff] }
 0x252   : > { %950 = vst [vmem:[%s909_s8 + $0x30] sm:$0xff] %v949_v59 }
 0x253 PF: > { %p12_p10 = scmp.ge.s32.totalorder %s1240_s22, 4   ;;  %s1466_s18 = smov %s1186_s19 }
 0x254   : > { %s1467_s19 = smov %s1251_s25  ;;  %s1468_s20 = smov %s1240_s22 }
 0x255   :  { %14 = sbr.rel (!%p12_p10) target bundleno = 2 (0x2), region = 151 }

// kernel: deblur_cnn_forward.3
= control target key start
LH: loop header
LB: loop body
LE: loop exit
PB: predicated region body
PF: predicated region fallthrough
CT: control target
= control target key end

     0   :  { %s1833_s12 = smov 0   ;;  %s1835_s13 = smov 0   ;;  %s2226_s0 = inlined_call_operand.vmem [shape: bf16[800,512], index: 0, kind: input, shape index: {}]   ;;  %s2227_s1 = inlined_call_operand.vmem [shape: bf16[8,800], index: 1, kind: input, shape index: {}]   ;;  %s2228_s2 = inlined_call_operand.vmem [shape: f32[8,1], index: 2, kind: input, shape index: {}]   ;;  %s2229_s3 = inlined_call_operand.vmem [shape: f32[8,512], index: 3, kind: output, shape index: {}]  }
   0x1   :  { %s1837_s14 = smov 0  }
   0x2 LB: > { %s1471_s15 = sadd.s32 4294967295, %s1810_s14   ;;  %s1850_s16 = sadd.s32 1, %s1810_s14   ;;  %s1810_s14 = sphi %s1837_s14, %s2232_s14   ;;  %s1806_s13 = sphi %s1835_s13, %s2231_s13   ;;  %s1802_s12 = sphi %s1833_s12, %s2230_s12  }
   0x3   : > { %s17_s17 = ssub.s32 %s1810_s14, %s1850_s16  ;;  %s20_s18 = sadd.s32 1, %s1806_s13 }
   0x4   : > { %p18_p0 = scmp.eq.s32.totalorder %s17_s17, 0  ;;  %p27_p1 = scmp.ne.s32.totalorder %s1806_s13, %s1802_s12 }
   0x5   : > { %p28_p2 = scmp.eq.s32.totalorder %s1810_s14, 0  ;;  %p1474_p4 = scmp.ge.s32.totalorder %s1810_s14, 2 }
   0x6   : > { %s1859_s19 = scalar_select %p18_p0, %s1806_s13, %s20_s18  }
   0x7   : > { %p29_p3 = por %p28_p2, %p27_p1  ;;  %127 = sbr.rel (%p1474_p4) target bundleno = 68 (0x44), region = 24 }
   0xe   : > { %130 = sbr.rel (!%p29_p3) target bundleno = 68 (0x44), region = 28  ;;  %s132_s20 = sand.u32 (%p29_p3), 1, %s1806_s13  }
   0xf   : > { %s1590_s21 = sshll.u32 (%p29_p3), %s1810_s14, 3  ;;  %s1603_s22 = smul.u32 (%p29_p3), 800, %s132_s20 }
  0x10   : > { %s1867_s25 = scalar_lea.vmem (%p29_p3), %s2226_s0, %s1590_s21 }
  0x11   : > { %v363_v0 = vld [vmem:[%s1867_s25] sm:$0xff] (%p29_p3)  ;;  %v365_v1 = vld [vmem:[%s1867_s25 + $0x10] sm:$0xff] (%p29_p3)  ;;  %s1875_s26 = scalar_lea.vmem (%p29_p3), [#allocation2], %s1603_s22 }
  0x12   : > { %v367_v2 = vld [vmem:[%s1867_s25 + $0x20] sm:$0xff] (%p29_p3)  ;;  %v369_v3 = vld [vmem:[%s1867_s25 + $0x30] sm:$0xff] (%p29_p3)  ;;  %364 = vst [vmem:[%s1875_s26] sm:$0xff] (%p29_p3), %v363_v0  ;;  %366 = vst [vmem:[%s1875_s26 + $0x8] sm:$0xff] (%p29_p3), %v365_v1 }
  0x13   : > { %v371_v4 = vld [vmem:[%s1867_s25 + $0x40] sm:$0xff] (%p29_p3)  ;;  %v373_v5 = vld [vmem:[%s1867_s25 + $0x50] sm:$0xff] (%p29_p3)  ;;  %368 = vst [vmem:[%s1875_s26 + $0x10] sm:$0xff] (%p29_p3), %v367_v2  ;;  %370 = vst [vmem:[%s1875_s26 + $0x18] sm:$0xff] (%p29_p3), %v369_v3 }
  0x14   : > { %372 = vst [vmem:[%s1875_s26 + $0x20] sm:$0xff] (%p29_p3), %v371_v4  ;;  %374 = vst [vmem:[%s1875_s26 + $0x28] sm:$0xff] (%p29_p3), %v373_v5  ;;  %v375_v6 = vld [vmem:[%s1867_s25 + $0x60] sm:$0xff] (%p29_p3)  ;;  %v377_v7 = vld [vmem:[%s1867_s25 + $0x70] sm:$0xff] (%p29_p3) }
  0x15   : > { %v379_v8 = vld [vmem:[%s1867_s25 + $0x80] sm:$0xff]  ;;  %376 = vst [vmem:[%s1875_s26 + $0x30] sm:$0xff] %v375_v6  ;;  %378 = vst [vmem:[%s1875_s26 + $0x38] sm:$0xff] %v377_v7  ;;  %v381_v9 = vld [vmem:[%s1867_s25 + $0x90] sm:$0xff] }
  0x16   : > { %380 = vst [vmem:[%s1875_s26 + $0x40] sm:$0xff] %v379_v8  ;;  %v383_v10 = vld [vmem:[%s1867_s25 + $0xa0] sm:$0xff]  ;;  %v385_v11 = vld [vmem:[%s1867_s25 + $0xb0] sm:$0xff]  ;;  %382 = vst [vmem:[%s1875_s26 + $0x48] sm:$0xff] %v381_v9 }
  0x17   : > { %384 = vst [vmem:[%s1875_s26 + $0x50] sm:$0xff] %v383_v10  ;;  %386 = vst [vmem:[%s1875_s26 + $0x58] sm:$0xff] %v385_v11  ;;  %v387_v12 = vld [vmem:[%s1867_s25 + $0xc0] sm:$0xff]  ;;  %v389_v13 = vld [vmem:[%s1867_s25 + $0xd0] sm:$0xff] }
  0x18   : > { %v391_v14 = vld [vmem:[%s1867_s25 + $0xe0] sm:$0xff]  ;;  %388 = vst [vmem:[%s1875_s26 + $0x60] sm:$0xff] %v387_v12  ;;  %390 = vst [vmem:[%s1875_s26 + $0x68] sm:$0xff] %v389_v13  ;;  %v393_v15 = vld [vmem:[%s1867_s25 + $0xf0] sm:$0xff] }
  0x19   : > { %392 = vst [vmem:[%s1875_s26 + $0x70] sm:$0xff] %v391_v14  ;;  %v395_v16 = vld [vmem:[%s1867_s25 + $0x100] sm:$0xff]  ;;  %v397_v17 = vld [vmem:[%s1867_s25 + $0x110] sm:$0xff]  ;;  %394 = vst [vmem:[%s1875_s26 + $0x78] sm:$0xff] %v393_v15 }
  0x1a   : > { %396 = vst [vmem:[%s1875_s26 + $0x80] sm:$0xff] %v395_v16  ;;  %398 = vst [vmem:[%s1875_s26 + $0x88] sm:$0xff] %v397_v17  ;;  %v399_v18 = vld [vmem:[%s1867_s25 + $0x120] sm:$0xff]  ;;  %v401_v19 = vld [vmem:[%s1867_s25 + $0x130] sm:$0xff] }
  0x1b   : > { %v403_v20 = vld [vmem:[%s1867_s25 + $0x140] sm:$0xff]  ;;  %400 = vst [vmem:[%s1875_s26 + $0x90] sm:$0xff] %v399_v18  ;;  %402 = vst [vmem:[%s1875_s26 + $0x98] sm:$0xff] %v401_v19  ;;  %v405_v21 = vld [vmem:[%s1867_s25 + $0x150] sm:$0xff] }
  0x1c   : > { %404 = vst [vmem:[%s1875_s26 + $0xa0] sm:$0xff] %v403_v20  ;;  %v407_v22 = vld [vmem:[%s1867_s25 + $0x160] sm:$0xff]  ;;  %v409_v23 = vld [vmem:[%s1867_s25 + $0x170] sm:$0xff]  ;;  %406 = vst [vmem:[%s1875_s26 + $0xa8] sm:$0xff] %v405_v21 }
  0x1d   : > { %408 = vst [vmem:[%s1875_s26 + $0xb0] sm:$0xff] %v407_v22  ;;  %410 = vst [vmem:[%s1875_s26 + $0xb8] sm:$0xff] %v409_v23  ;;  %v411_v24 = vld [vmem:[%s1867_s25 + $0x180] sm:$0xff]  ;;  %v413_v25 = vld [vmem:[%s1867_s25 + $0x190] sm:$0xff] }
  0x1e   : > { %v415_v26 = vld [vmem:[%s1867_s25 + $0x1a0] sm:$0xff]  ;;  %412 = vst [vmem:[%s1875_s26 + $0xc0] sm:$0xff] %v411_v24  ;;  %414 = vst [vmem:[%s1875_s26 + $0xc8] sm:$0xff] %v413_v25  ;;  %v417_v27 = vld [vmem:[%s1867_s25 + $0x1b0] sm:$0xff] }
  0x1f   : > { %416 = vst [vmem:[%s1875_s26 + $0xd0] sm:$0xff] %v415_v26  ;;  %v419_v28 = vld [vmem:[%s1867_s25 + $0x1c0] sm:$0xff]  ;;  %v421_v29 = vld [vmem:[%s1867_s25 + $0x1d0] sm:$0xff]  ;;  %418 = vst [vmem:[%s1875_s26 + $0xd8] sm:$0xff] %v417_v27 }
  0x20   : > { %420 = vst [vmem:[%s1875_s26 + $0xe0] sm:$0xff] %v419_v28  ;;  %422 = vst [vmem:[%s1875_s26 + $0xe8] sm:$0xff] %v421_v29  ;;  %v423_v30 = vld [vmem:[%s1867_s25 + $0x1e0] sm:$0xff]  ;;  %v425_v31 = vld [vmem:[%s1867_s25 + $0x1f0] sm:$0xff] }
  0x21   : > { %v427_v32 = vld [vmem:[%s1867_s25 + $0x200] sm:$0xff]  ;;  %424 = vst [vmem:[%s1875_s26 + $0xf0] sm:$0xff] %v423_v30  ;;  %426 = vst [vmem:[%s1875_s26 + $0xf8] sm:$0xff] %v425_v31  ;;  %v429_v33 = vld [vmem:[%s1867_s25 + $0x210] sm:$0xff] }
  0x22   : > { %428 = vst [vmem:[%s1875_s26 + $0x100] sm:$0xff] %v427_v32  ;;  %v431_v34 = vld [vmem:[%s1867_s25 + $0x220] sm:$0xff]  ;;  %v433_v35 = vld [vmem:[%s1867_s25 + $0x230] sm:$0xff]  ;;  %430 = vst [vmem:[%s1875_s26 + $0x108] sm:$0xff] %v429_v33 }
  0x23   : > { %432 = vst [vmem:[%s1875_s26 + $0x110] sm:$0xff] %v431_v34  ;;  %434 = vst [vmem:[%s1875_s26 + $0x118] sm:$0xff] %v433_v35  ;;  %v435_v36 = vld [vmem:[%s1867_s25 + $0x240] sm:$0xff]  ;;  %v437_v37 = vld [vmem:[%s1867_s25 + $0x250] sm:$0xff] }
  0x24   : > { %v439_v38 = vld [vmem:[%s1867_s25 + $0x260] sm:$0xff]  ;;  %436 = vst [vmem:[%s1875_s26 + $0x120] sm:$0xff] %v435_v36  ;;  %438 = vst [vmem:[%s1875_s26 + $0x128] sm:$0xff] %v437_v37  ;;  %v441_v39 = vld [vmem:[%s1867_s25 + $0x270] sm:$0xff] }
  0x25   : > { %440 = vst [vmem:[%s1875_s26 + $0x130] sm:$0xff] %v439_v38  ;;  %v443_v40 = vld [vmem:[%s1867_s25 + $0x280] sm:$0xff]  ;;  %v445_v41 = vld [vmem:[%s1867_s25 + $0x290] sm:$0xff]  ;;  %442 = vst [vmem:[%s1875_s26 + $0x138] sm:$0xff] %v441_v39 }
  0x26   : > { %444 = vst [vmem:[%s1875_s26 + $0x140] sm:$0xff] %v443_v40  ;;  %446 = vst [vmem:[%s1875_s26 + $0x148] sm:$0xff] %v445_v41  ;;  %v447_v42 = vld [vmem:[%s1867_s25 + $0x2a0] sm:$0xff]  ;;  %v449_v43 = vld [vmem:[%s1867_s25 + $0x2b0] sm:$0xff] }
  0x27   : > { %v451_v44 = vld [vmem:[%s1867_s25 + $0x2c0] sm:$0xff]  ;;  %448 = vst [vmem:[%s1875_s26 + $0x150] sm:$0xff] %v447_v42  ;;  %450 = vst [vmem:[%s1875_s26 + $0x158] sm:$0xff] %v449_v43  ;;  %v453_v45 = vld [vmem:[%s1867_s25 + $0x2d0] sm:$0xff] }
  0x28   : > { %452 = vst [vmem:[%s1875_s26 + $0x160] sm:$0xff] %v451_v44  ;;  %v455_v46 = vld [vmem:[%s1867_s25 + $0x2e0] sm:$0xff]  ;;  %v457_v47 = vld [vmem:[%s1867_s25 + $0x2f0] sm:$0xff]  ;;  %454 = vst [vmem:[%s1875_s26 + $0x168] sm:$0xff] %v453_v45 }
  0x29   : > { %456 = vst [vmem:[%s1875_s26 + $0x170] sm:$0xff] %v455_v46  ;;  %458 = vst [vmem:[%s1875_s26 + $0x178] sm:$0xff] %v457_v47  ;;  %v459_v48 = vld [vmem:[%s1867_s25 + $0x300] sm:$0xff]  ;;  %v461_v49 = vld [vmem:[%s1867_s25 + $0x310] sm:$0xff] }
  0x2a   : > { %v463_v50 = vld [vmem:[%s1867_s25 + $0x320] sm:$0xff]  ;;  %460 = vst [vmem:[%s1875_s26 + $0x180] sm:$0xff] %v459_v48  ;;  %462 = vst [vmem:[%s1875_s26 + $0x188] sm:$0xff] %v461_v49  ;;  %v465_v51 = vld [vmem:[%s1867_s25 + $0x330] sm:$0xff] }
  0x2b   : > { %464 = vst [vmem:[%s1875_s26 + $0x190] sm:$0xff] %v463_v50  ;;  %v467_v52 = vld [vmem:[%s1867_s25 + $0x340] sm:$0xff]  ;;  %v469_v53 = vld [vmem:[%s1867_s25 + $0x350] sm:$0xff]  ;;  %466 = vst [vmem:[%s1875_s26 + $0x198] sm:$0xff] %v465_v51 }
  0x2c   : > { %468 = vst [vmem:[%s1875_s26 + $0x1a0] sm:$0xff] %v467_v52  ;;  %470 = vst [vmem:[%s1875_s26 + $0x1a8] sm:$0xff] %v469_v53  ;;  %v471_v54 = vld [vmem:[%s1867_s25 + $0x360] sm:$0xff]  ;;  %v473_v55 = vld [vmem:[%s1867_s25 + $0x370] sm:$0xff] }
  0x2d   : > { %v475_v56 = vld [vmem:[%s1867_s25 + $0x380] sm:$0xff]  ;;  %472 = vst [vmem:[%s1875_s26 + $0x1b0] sm:$0xff] %v471_v54  ;;  %474 = vst [vmem:[%s1875_s26 + $0x1b8] sm:$0xff] %v473_v55  ;;  %v477_v57 = vld [vmem:[%s1867_s25 + $0x390] sm:$0xff] }
  0x2e   : > { %476 = vst [vmem:[%s1875_s26 + $0x1c0] sm:$0xff] %v475_v56  ;;  %v479_v58 = vld [vmem:[%s1867_s25 + $0x3a0] sm:$0xff]  ;;  %v481_v59 = vld [vmem:[%s1867_s25 + $0x3b0] sm:$0xff]  ;;  %478 = vst [vmem:[%s1875_s26 + $0x1c8] sm:$0xff] %v477_v57 }
  0x2f   : > { %480 = vst [vmem:[%s1875_s26 + $0x1d0] sm:$0xff] %v479_v58  ;;  %482 = vst [vmem:[%s1875_s26 + $0x1d8] sm:$0xff] %v481_v59  ;;  %v483_v60 = vld [vmem:[%s1867_s25 + $0x3c0] sm:$0xff]  ;;  %v485_v61 = vld [vmem:[%s1867_s25 + $0x3d0] sm:$0xff] }
  0x30   : > { %v487_v62 = vld [vmem:[%s1867_s25 + $0x3e0] sm:$0xff]  ;;  %484 = vst [vmem:[%s1875_s26 + $0x1e0] sm:$0xff] %v483_v60  ;;  %486 = vst [vmem:[%s1875_s26 + $0x1e8] sm:$0xff] %v485_v61  ;;  %v489_v63 = vld [vmem:[%s1867_s25 + $0x3f0] sm:$0xff] }
  0x31   : > { %488 = vst [vmem:[%s1875_s26 + $0x1f0] sm:$0xff] %v487_v62  ;;  %v491_v0 = vld [vmem:[%s1867_s25 + $0x400] sm:$0xff]  ;;  %v493_v1 = vld [vmem:[%s1867_s25 + $0x410] sm:$0xff]  ;;  %490 = vst [vmem:[%s1875_s26 + $0x1f8] sm:$0xff] %v489_v63 }
  0x32   : > { %492 = vst [vmem:[%s1875_s26 + $0x200] sm:$0xff] %v491_v0  ;;  %494 = vst [vmem:[%s1875_s26 + $0x208] sm:$0xff] %v493_v1  ;;  %v495_v2 = vld [vmem:[%s1867_s25 + $0x420] sm:$0xff]  ;;  %v497_v3 = vld [vmem:[%s1867_s25 + $0x430] sm:$0xff] }
  0x33   : > { %v499_v4 = vld [vmem:[%s1867_s25 + $0x440] sm:$0xff]  ;;  %496 = vst [vmem:[%s1875_s26 + $0x210] sm:$0xff] %v495_v2  ;;  %498 = vst [vmem:[%s1875_s26 + $0x218] sm:$0xff] %v497_v3  ;;  %v501_v5 = vld [vmem:[%s1867_s25 + $0x450] sm:$0xff] }
  0x34   : > { %500 = vst [vmem:[%s1875_s26 + $0x220] sm:$0xff] %v499_v4  ;;  %v503_v6 = vld [vmem:[%s1867_s25 + $0x460] sm:$0xff]  ;;  %v505_v7 = vld [vmem:[%s1867_s25 + $0x470] sm:$0xff]  ;;  %502 = vst [vmem:[%s1875_s26 + $0x228] sm:$0xff] %v501_v5 }
  0x35   : > { %504 = vst [vmem:[%s1875_s26 + $0x230] sm:$0xff] %v503_v6  ;;  %506 = vst [vmem:[%s1875_s26 + $0x238] sm:$0xff] %v505_v7  ;;  %v507_v8 = vld [vmem:[%s1867_s25 + $0x480] sm:$0xff]  ;;  %v509_v9 = vld [vmem:[%s1867_s25 + $0x490] sm:$0xff] }
  0x36   : > { %v511_v10 = vld [vmem:[%s1867_s25 + $0x4a0] sm:$0xff]  ;;  %508 = vst [vmem:[%s1875_s26 + $0x240] sm:$0xff] %v507_v8  ;;  %510 = vst [vmem:[%s1875_s26 + $0x248] sm:$0xff] %v509_v9  ;;  %v513_v11 = vld [vmem:[%s1867_s25 + $0x4b0] sm:$0xff] }
  0x37   : > { %512 = vst [vmem:[%s1875_s26 + $0x250] sm:$0xff] %v511_v10  ;;  %v515_v12 = vld [vmem:[%s1867_s25 + $0x4c0] sm:$0xff]  ;;  %v517_v13 = vld [vmem:[%s1867_s25 + $0x4d0] sm:$0xff]  ;;  %514 = vst [vmem:[%s1875_s26 + $0x258] sm:$0xff] %v513_v11 }
  0x38   : > { %516 = vst [vmem:[%s1875_s26 + $0x260] sm:$0xff] %v515_v12  ;;  %518 = vst [vmem:[%s1875_s26 + $0x268] sm:$0xff] %v517_v13  ;;  %v519_v14 = vld [vmem:[%s1867_s25 + $0x4e0] sm:$0xff]  ;;  %v521_v15 = vld [vmem:[%s1867_s25 + $0x4f0] sm:$0xff] }
  0x39   : > { %v523_v16 = vld [vmem:[%s1867_s25 + $0x500] sm:$0xff]  ;;  %520 = vst [vmem:[%s1875_s26 + $0x270] sm:$0xff] %v519_v14  ;;  %522 = vst [vmem:[%s1875_s26 + $0x278] sm:$0xff] %v521_v15  ;;  %v525_v17 = vld [vmem:[%s1867_s25 + $0x510] sm:$0xff] }
  0x3a   : > { %524 = vst [vmem:[%s1875_s26 + $0x280] sm:$0xff] %v523_v16  ;;  %v527_v18 = vld [vmem:[%s1867_s25 + $0x520] sm:$0xff]  ;;  %v529_v19 = vld [vmem:[%s1867_s25 + $0x530] sm:$0xff]  ;;  %526 = vst [vmem:[%s1875_s26 + $0x288] sm:$0xff] %v525_v17 }
  0x3b   : > { %528 = vst [vmem:[%s1875_s26 + $0x290] sm:$0xff] %v527_v18  ;;  %530 = vst [vmem:[%s1875_s26 + $0x298] sm:$0xff] %v529_v19  ;;  %v531_v20 = vld [vmem:[%s1867_s25 + $0x540] sm:$0xff]  ;;  %v533_v21 = vld [vmem:[%s1867_s25 + $0x550] sm:$0xff] }
  0x3c   : > { %v535_v22 = vld [vmem:[%s1867_s25 + $0x560] sm:$0xff]  ;;  %532 = vst [vmem:[%s1875_s26 + $0x2a0] sm:$0xff] %v531_v20  ;;  %534 = vst [vmem:[%s1875_s26 + $0x2a8] sm:$0xff] %v533_v21  ;;  %v537_v23 = vld [vmem:[%s1867_s25 + $0x570] sm:$0xff] }
  0x3d   : > { %536 = vst [vmem:[%s1875_s26 + $0x2b0] sm:$0xff] %v535_v22  ;;  %v539_v24 = vld [vmem:[%s1867_s25 + $0x580] sm:$0xff]  ;;  %v541_v25 = vld [vmem:[%s1867_s25 + $0x590] sm:$0xff]  ;;  %538 = vst [vmem:[%s1875_s26 + $0x2b8] sm:$0xff] %v537_v23 }
  0x3e   : > { %540 = vst [vmem:[%s1875_s26 + $0x2c0] sm:$0xff] %v539_v24  ;;  %542 = vst [vmem:[%s1875_s26 + $0x2c8] sm:$0xff] %v541_v25  ;;  %v543_v26 = vld [vmem:[%s1867_s25 + $0x5a0] sm:$0xff]  ;;  %v545_v27 = vld [vmem:[%s1867_s25 + $0x5b0] sm:$0xff] }
  0x3f   : > { %v547_v28 = vld [vmem:[%s1867_s25 + $0x5c0] sm:$0xff]  ;;  %544 = vst [vmem:[%s1875_s26 + $0x2d0] sm:$0xff] %v543_v26  ;;  %546 = vst [vmem:[%s1875_s26 + $0x2d8] sm:$0xff] %v545_v27  ;;  %v549_v29 = vld [vmem:[%s1867_s25 + $0x5d0] sm:$0xff] }
  0x40   : > { %548 = vst [vmem:[%s1875_s26 + $0x2e0] sm:$0xff] %v547_v28  ;;  %v551_v30 = vld [vmem:[%s1867_s25 + $0x5e0] sm:$0xff]  ;;  %v553_v31 = vld [vmem:[%s1867_s25 + $0x5f0] sm:$0xff]  ;;  %550 = vst [vmem:[%s1875_s26 + $0x2e8] sm:$0xff] %v549_v29 }
  0x41   : > { %552 = vst [vmem:[%s1875_s26 + $0x2f0] sm:$0xff] %v551_v30  ;;  %554 = vst [vmem:[%s1875_s26 + $0x2f8] sm:$0xff] %v553_v31  ;;  %v555_v32 = vld [vmem:[%s1867_s25 + $0x600] sm:$0xff]  ;;  %v557_v33 = vld [vmem:[%s1867_s25 + $0x610] sm:$0xff] }
  0x42   : > { %v559_v34 = vld [vmem:[%s1867_s25 + $0x620] sm:$0xff]  ;;  %556 = vst [vmem:[%s1875_s26 + $0x300] sm:$0xff] %v555_v32  ;;  %558 = vst [vmem:[%s1875_s26 + $0x308] sm:$0xff] %v557_v33  ;;  %v561_v35 = vld [vmem:[%s1867_s25 + $0x630] sm:$0xff] }
  0x43   : > { %560 = vst [vmem:[%s1875_s26 + $0x310] sm:$0xff] %v559_v34  ;;  %562 = vst [vmem:[%s1875_s26 + $0x318] sm:$0xff] %v561_v35 }
  0x44 PF: > { %p1477_p5 = scmp.ge.s32.totalorder %s1810_s14, 1  ;;  %p567_p6 = scmp.lt.s32.totalorder %s1810_s14, 3 }
  0x46   : > { %p568_p7 = pnand %p1477_p5, %p567_p6 }
  0x47   : > { %s574_s27 = sand.u32 (!%p568_p7), 1, %s1802_s12   ;;  %v2077_v36 = vld [vmem:[%s2227_s1] sm:$0xff] (!%p568_p7)  ;;  %v2082_v37 = vld [vmem:[%s2227_s1 + $0x10] sm:$0xff] (!%p568_p7)  ;;  %v1812_v40 = vmov (!%p568_p7), 0   ;;  %v2151_v34 = vld [vmem:[%s2227_s1 + $0x8] sm:$0xff] (!%p568_p7)  ;;  %vm1239_vm0 = vcmask (!%p568_p7), 261120  }
  0x48   : > { %571 = sbr.rel (%p568_p7) target bundleno = 423 (0x1a7), region = 66  ;;  %v1481_v38 = vcombine.high (!%p568_p7), %v2077_v36, %v2077_v36  ;;  %v1485_v39 = vcombine.high (!%p568_p7), %v2082_v37, %v2082_v37  ;;  %1630 = vset.pattern.permute.xlu0 (!%p568_p7), %v1812_v40  ;;  %s1478_s17 = sshll.u32 (!%p568_p7), %s1471_s15, 1 }
  0x49   : > { %s1604_s5 = smul.u32 (!%p568_p7), 800, %s574_s27  ;;  %p599_p8 = scmp.lt.s32.totalorder (!%p568_p7), %s1478_s17, 3 }
  0x4a   : > { %1275 = vmatprep.mubr.bf16.mxu1 (!%p568_p7), %v1481_v38  ;;  %1357 = vmatprep.mubr.bf16.mxu0 (!%p568_p7), %v1485_v39  ;;  %v1480_v39 = vcombine.low (!%p568_p7), %v2077_v36, %v2077_v36  ;;  %v709_v36 = vld [vmem:[%s2228_s2] sm:$0xff] (!%p568_p7) }
  0x4b   : > { %s2089_s6 = scalar_lea.vmem (!%p568_p7), [#allocation2], %s1604_s5  ;;  %712 = vperm.xlu0 (!%p568_p7), %1630, %v709_v36  }
  0x4c   : > { %v1631_v41 = vld [vmem:[%s2089_s6 + $0x4] ss:$8 sps:$4 sm:$0xff] (!%p568_p7)   ;;  %v1633_v42 = vld [vmem:[%s2089_s6] ss:$8 sps:$4 sm:$0xff] (!%p568_p7)   ;;  %v1634_v43 = vld [vmem:[%s2089_s6 + $0x14] ss:$8 sps:$4 sm:$0xff] (!%p568_p7)  }
  0x4d   : > { %1243 = vmatprep.subr.bf16.mxu1 (!%p568_p7), %v1631_v41  ;;  %v1636_v44 = vld [vmem:[%s2089_s6 + $0x10] ss:$8 sps:$4 sm:$0xff] (!%p568_p7)   ;;  %v1637_v45 = vld [vmem:[%s2089_s6 + $0x24] ss:$8 sps:$4 sm:$0xff] (!%p568_p7)   ;;  %v1639_v46 = vld [vmem:[%s2089_s6 + $0x20] ss:$8 sps:$4 sm:$0xff] (!%p568_p7)  }
  0x4e   : > { %1244 = vmatpush1.bf16.msra.mxu1 (!%p568_p7), %v1633_v42  ;;  %v1640_v47 = vld [vmem:[%s2089_s6 + $0x34] ss:$8 sps:$4 sm:$0xff] (!%p568_p7)   ;;  %v1642_v48 = vld [vmem:[%s2089_s6 + $0x30] ss:$8 sps:$4 sm:$0xff] (!%p568_p7)   ;;  %v1643_v49 = vld [vmem:[%s2089_s6 + $0x44] ss:$8 sps:$4 sm:$0xff] (!%p568_p7)  }
  0x4f   : > { %1245 = vmatprep.subr.bf16.mxu1 %v1634_v43  ;;  %v1661_v50 = vld [vmem:[%s2089_s6 + $0x204] ss:$8 sps:$4 sm:$0xff]   ;;  %v1645_v51 = vld [vmem:[%s2089_s6 + $0x40] ss:$8 sps:$4 sm:$0xff]   ;;  %v1646_v52 = vld [vmem:[%s2089_s6 + $0x54] ss:$8 sps:$4 sm:$0xff]   ;;  %v1483_v43 = vcombine.high %v2151_v34, %v2151_v34 }
  0x50   : > { %v1665_v53 = vld [vmem:[%s2089_s6 + $0x200] ss:$8 sps:$4 sm:$0xff]   ;;  %1325 = vmatprep.subr.bf16.mxu0 %v1661_v50  ;;  %v1667_v54 = vld [vmem:[%s2089_s6 + $0x214] ss:$8 sps:$4 sm:$0xff]   ;;  %v1648_v55 = vld [vmem:[%s2089_s6 + $0x50] ss:$8 sps:$4 sm:$0xff]  }
  0x51   : > { %1326 = vmatpush1.bf16.msra.mxu0 %v1665_v53  ;;  %v1671_v56 = vld [vmem:[%s2089_s6 + $0x210] ss:$8 sps:$4 sm:$0xff]   ;;  %v1673_v57 = vld [vmem:[%s2089_s6 + $0x224] ss:$8 sps:$4 sm:$0xff]   ;;  %v1677_v59 = vld [vmem:[%s2089_s6 + $0x220] ss:$8 sps:$4 sm:$0xff]  }
  0x52   : > { %1246 = vmatpush1.bf16.msra.mxu1 %v1636_v44  ;;  %1327 = vmatprep.subr.bf16.mxu0 %v1667_v54  ;;  %v1649_v58 = vld [vmem:[%s2089_s6 + $0x64] ss:$8 sps:$4 sm:$0xff]   ;;  %v1679_v60 = vld [vmem:[%s2089_s6 + $0x234] ss:$8 sps:$4 sm:$0xff]   ;;  %v1651_v61 = vld [vmem:[%s2089_s6 + $0x60] ss:$8 sps:$4 sm:$0xff]  }
  0x53   : > { %1247 = vmatprep.subr.bf16.mxu1 %v1637_v45  ;;  %v1652_v62 = vld [vmem:[%s2089_s6 + $0x74] ss:$8 sps:$4 sm:$0xff]   ;;  %v1683_v63 = vld [vmem:[%s2089_s6 + $0x230] ss:$8 sps:$4 sm:$0xff]   ;;  %v1685_v0 = vld [vmem:[%s2089_s6 + $0x244] ss:$8 sps:$4 sm:$0xff]  }
  0x54   : > { %v1654_v1 = vld [vmem:[%s2089_s6 + $0x70] ss:$8 sps:$4 sm:$0xff]   ;;  %v1655_v2 = vld [vmem:[%s2089_s6 + $0x84] ss:$8 sps:$4 sm:$0xff]   ;;  %v1689_v3 = vld [vmem:[%s2089_s6 + $0x240] ss:$8 sps:$4 sm:$0xff]  }
  0x55   : > { %1328 = vmatpush1.bf16.msra.mxu0 %v1671_v56  ;;  %v1691_v4 = vld [vmem:[%s2089_s6 + $0x254] ss:$8 sps:$4 sm:$0xff]   ;;  %v1657_v5 = vld [vmem:[%s2089_s6 + $0x80] ss:$8 sps:$4 sm:$0xff]   ;;  %v1695_v7 = vld [vmem:[%s2089_s6 + $0x250] ss:$8 sps:$4 sm:$0xff]  }
  0x56   : > { %1248 = vmatpush1.bf16.msra.mxu1 %v1639_v46  ;;  %1329 = vmatprep.subr.bf16.mxu0 %v1673_v57  ;;  %v1658_v6 = vld [vmem:[%s2089_s6 + $0x94] ss:$8 sps:$4 sm:$0xff]   ;;  %v1697_v8 = vld [vmem:[%s2089_s6 + $0x264] ss:$8 sps:$4 sm:$0xff]   ;;  %v1660_v9 = vld [vmem:[%s2089_s6 + $0x90] ss:$8 sps:$4 sm:$0xff]   ;;  %v1484_v57 = vcombine.low %v2082_v37, %v2082_v37 }
  0x57   : > { %1249 = vmatprep.subr.bf16.mxu1 %v1640_v47  ;;  %v1663_v10 = vld [vmem:[%s2089_s6 + $0xa4] ss:$8 sps:$4 sm:$0xff]   ;;  %v1704_v11 = vld [vmem:[%s2089_s6 + $0x260] ss:$8 sps:$4 sm:$0xff]   ;;  %v1705_v12 = vld [vmem:[%s2089_s6 + $0x274] ss:$8 sps:$4 sm:$0xff]  }
  0x58   : > { %v1666_v13 = vld [vmem:[%s2089_s6 + $0xa0] ss:$8 sps:$4 sm:$0xff]   ;;  %v1669_v14 = vld [vmem:[%s2089_s6 + $0xb4] ss:$8 sps:$4 sm:$0xff]   ;;  %v1710_v15 = vld [vmem:[%s2089_s6 + $0x270] ss:$8 sps:$4 sm:$0xff]  }
  0x59   : > { %1330 = vmatpush1.bf16.msra.mxu0 %v1677_v59  ;;  %v1711_v16 = vld [vmem:[%s2089_s6 + $0x284] ss:$8 sps:$4 sm:$0xff]   ;;  %v1672_v17 = vld [vmem:[%s2089_s6 + $0xb0] ss:$8 sps:$4 sm:$0xff]   ;;  %v1716_v19 = vld [vmem:[%s2089_s6 + $0x280] ss:$8 sps:$4 sm:$0xff]  }
  0x5a   : > { %1250 = vmatpush1.bf16.msra.mxu1 %v1642_v48  ;;  %1331 = vmatprep.subr.bf16.mxu0 %v1679_v60  ;;  %v1675_v18 = vld [vmem:[%s2089_s6 + $0xc4] ss:$8 sps:$4 sm:$0xff]   ;;  %v1717_v20 = vld [vmem:[%s2089_s6 + $0x294] ss:$8 sps:$4 sm:$0xff]   ;;  %v1678_v21 = vld [vmem:[%s2089_s6 + $0xc0] ss:$8 sps:$4 sm:$0xff]  }
  0x5b   : > { %1251 = vmatprep.subr.bf16.mxu1 %v1643_v49  ;;  %v1681_v22 = vld [vmem:[%s2089_s6 + $0xd4] ss:$8 sps:$4 sm:$0xff]   ;;  %v1722_v23 = vld [vmem:[%s2089_s6 + $0x290] ss:$8 sps:$4 sm:$0xff]   ;;  %v1723_v24 = vld [vmem:[%s2089_s6 + $0x2a4] ss:$8 sps:$4 sm:$0xff]  }
  0x5c   : > { %v1684_v25 = vld [vmem:[%s2089_s6 + $0xd0] ss:$8 sps:$4 sm:$0xff]   ;;  %v1687_v26 = vld [vmem:[%s2089_s6 + $0xe4] ss:$8 sps:$4 sm:$0xff]   ;;  %v1728_v27 = vld [vmem:[%s2089_s6 + $0x2a0] ss:$8 sps:$4 sm:$0xff]  }
  0x5d   : > { %1332 = vmatpush1.bf16.msra.mxu0 %v1683_v63  ;;  %v1729_v28 = vld [vmem:[%s2089_s6 + $0x2b4] ss:$8 sps:$4 sm:$0xff]   ;;  %v1690_v29 = vld [vmem:[%s2089_s6 + $0xe0] ss:$8 sps:$4 sm:$0xff]   ;;  %v1734_v31 = vld [vmem:[%s2089_s6 + $0x2b0] ss:$8 sps:$4 sm:$0xff]  }
  0x5e   : > { %1252 = vmatpush1.bf16.msra.mxu1 %v1645_v51  ;;  %1333 = vmatprep.subr.bf16.mxu0 %v1685_v0  ;;  %v1693_v30 = vld [vmem:[%s2089_s6 + $0xf4] ss:$8 sps:$4 sm:$0xff]   ;;  %v1735_v32 = vld [vmem:[%s2089_s6 + $0x2c4] ss:$8 sps:$4 sm:$0xff]   ;;  %v1696_v33 = vld [vmem:[%s2089_s6 + $0xf0] ss:$8 sps:$4 sm:$0xff]  }
  0x5f   : > { %1253 = vmatprep.subr.bf16.mxu1 %v1646_v52  ;;  %v1703_v35 = vld [vmem:[%s2089_s6 + $0x104] ss:$8 sps:$4 sm:$0xff]   ;;  %v1740_v38 = vld [vmem:[%s2089_s6 + $0x2c0] ss:$8 sps:$4 sm:$0xff]   ;;  %v1741_v41 = vld [vmem:[%s2089_s6 + $0x2d4] ss:$8 sps:$4 sm:$0xff]  }
  0x60   : > { %v1701_v42 = vld [vmem:[%s2089_s6 + $0x100] ss:$8 sps:$4 sm:$0xff]   ;;  %v1709_v44 = vld [vmem:[%s2089_s6 + $0x114] ss:$8 sps:$4 sm:$0xff]   ;;  %v1746_v45 = vld [vmem:[%s2089_s6 + $0x2d0] ss:$8 sps:$4 sm:$0xff]  }
  0x61   : > { %1334 = vmatpush1.bf16.msra.mxu0 %v1689_v3  ;;  %v1747_v46 = vld [vmem:[%s2089_s6 + $0x2e4] ss:$8 sps:$4 sm:$0xff]   ;;  %v1707_v47 = vld [vmem:[%s2089_s6 + $0x110] ss:$8 sps:$4 sm:$0xff]   ;;  %v1752_v49 = vld [vmem:[%s2089_s6 + $0x2e0] ss:$8 sps:$4 sm:$0xff]  }
  0x62   : > { %1254 = vmatpush1.bf16.msra.mxu1 %v1648_v55  ;;  %1335 = vmatprep.subr.bf16.mxu0 %v1691_v4  ;;  %v1715_v48 = vld [vmem:[%s2089_s6 + $0x124] ss:$8 sps:$4 sm:$0xff]   ;;  %v1753_v50 = vld [vmem:[%s2089_s6 + $0x2f4] ss:$8 sps:$4 sm:$0xff]   ;;  %v1713_v51 = vld [vmem:[%s2089_s6 + $0x120] ss:$8 sps:$4 sm:$0xff]  }
  0x63   : > { %1255 = vmatprep.subr.bf16.mxu1 %v1649_v58  ;;  %v1721_v52 = vld [vmem:[%s2089_s6 + $0x134] ss:$8 sps:$4 sm:$0xff]   ;;  %v1758_v53 = vld [vmem:[%s2089_s6 + $0x2f0] ss:$8 sps:$4 sm:$0xff]   ;;  %v1766_v54 = vld [vmem:[%s2089_s6 + $0x304] ss:$8 sps:$4 sm:$0xff]  }
  0x64   : > { %v1719_v55 = vld [vmem:[%s2089_s6 + $0x130] ss:$8 sps:$4 sm:$0xff]   ;;  %v1727_v56 = vld [vmem:[%s2089_s6 + $0x144] ss:$8 sps:$4 sm:$0xff]   ;;  %v1764_v58 = vld [vmem:[%s2089_s6 + $0x300] ss:$8 sps:$4 sm:$0xff]  }
  0x65   : > { %1336 = vmatpush1.bf16.msra.mxu0 %v1695_v7  ;;  %v1772_v59 = vld [vmem:[%s2089_s6 + $0x314] ss:$8 sps:$4 sm:$0xff]   ;;  %v1725_v60 = vld [vmem:[%s2089_s6 + $0x140] ss:$8 sps:$4 sm:$0xff]   ;;  %v1731_v37 = vld [vmem:[%s2089_s6 + $0x150] ss:$8 sps:$4 sm:$0xff]  }
  0x66   : > { %1256 = vmatpush1.bf16.msra.mxu1 %v1651_v61  ;;  %1337 = vmatprep.subr.bf16.mxu0 %v1697_v8  ;;  %v1733_v61 = vld [vmem:[%s2089_s6 + $0x154] ss:$8 sps:$4 sm:$0xff]   ;;  %v1739_v63 = vld [vmem:[%s2089_s6 + $0x164] ss:$8 sps:$4 sm:$0xff]   ;;  %v1737_v0 = vld [vmem:[%s2089_s6 + $0x160] ss:$8 sps:$4 sm:$0xff]  }
  0x67   : > { %1257 = vmatprep.subr.bf16.mxu1 %v1652_v62  ;;  %v1770_v62 = vld [vmem:[%s2089_s6 + $0x310] ss:$8 sps:$4 sm:$0xff]   ;;  %v1751_v3 = vld [vmem:[%s2089_s6 + $0x184] ss:$8 sps:$4 sm:$0xff]   ;;  %v1749_v4 = vld [vmem:[%s2089_s6 + $0x180] ss:$8 sps:$4 sm:$0xff]  }
  0x68   : > { %v1763_v7 = vld [vmem:[%s2089_s6 + $0x1a4] ss:$8 sps:$4 sm:$0xff]   ;;  %v1761_v8 = vld [vmem:[%s2089_s6 + $0x1a0] ss:$8 sps:$4 sm:$0xff]   ;;  %s2234_s17 = smov (!%p599_p8, %s1478_s17), 3 }
  0x69   : > { %1338 = vmatpush1.bf16.msra.mxu0 %v1704_v11  ;;  %v1775_v11 = vld [vmem:[%s2089_s6 + $0x1c4] ss:$8 sps:$4 sm:$0xff]   ;;  %s1479_s18 = sshll.u32 %s2234_s17, 3 }
  0x6a   : > { %1258 = vmatpush1.bf16.msra.mxu1 %v1654_v1  ;;  %1339 = vmatprep.subr.bf16.mxu0 %v1705_v12  ;;  %v1745_v1 = vld [vmem:[%s2089_s6 + $0x174] ss:$8 sps:$4 sm:$0xff]   ;;  %v1773_v12 = vld [vmem:[%s2089_s6 + $0x1c0] ss:$8 sps:$4 sm:$0xff]   ;;  %s602_s22 = scalar_lea.vmem %s2229_s3, %s1479_s18 }
  0x6b   : > { %1259 = vmatprep.subr.bf16.mxu1 %v1655_v2  ;;  %v1776_v2 = vld [vmem:[%s2227_s1 + $0x18] ss:$0 sps:$4 sm:$0xff]  }
  0x6d   : > { %1340 = vmatpush1.bf16.msra.mxu0 %v1710_v15  ;;  %v1782_v15 = vld [vmem:[%s2089_s6 + $0x1e4] ss:$8 sps:$4 sm:$0xff]  }
  0x6e   : > { %1260 = vmatpush1.bf16.msra.mxu1 %v1657_v5  ;;  %1341 = vmatprep.subr.bf16.mxu0 %v1711_v16  ;;  %v1757_v5 = vld [vmem:[%s2089_s6 + $0x194] ss:$8 sps:$4 sm:$0xff]   ;;  %v1780_v16 = vld [vmem:[%s2089_s6 + $0x1e0] ss:$8 sps:$4 sm:$0xff]  }
  0x6f   : > { %1261 = vmatprep.subr.bf16.mxu1 %v1658_v6  ;;  %v1755_v6 = vld [vmem:[%s2089_s6 + $0x190] ss:$8 sps:$4 sm:$0xff]  }
  0x71   : > { %1342 = vmatpush1.bf16.msra.mxu0 %v1716_v19  ;;  %v1482_v19 = vcombine.low %v2151_v34, %v2151_v34 }
  0x72   : > { %1262 = vmatpush1.bf16.msra.mxu1 %v1660_v9  ;;  %1343 = vmatprep.subr.bf16.mxu0 %v1717_v20  ;;  %v1769_v9 = vld [vmem:[%s2089_s6 + $0x1b4] ss:$8 sps:$4 sm:$0xff]  }
  0x73   : > { %1263 = vmatprep.subr.bf16.mxu1 %v1663_v10  ;;  %v1767_v10 = vld [vmem:[%s2089_s6 + $0x1b0] ss:$8 sps:$4 sm:$0xff]  }
  0x75   : > { %1344 = vmatpush1.bf16.msra.mxu0 %v1722_v23 }
  0x76   : > { %1264 = vmatpush1.bf16.msra.mxu1 %v1666_v13  ;;  %1345 = vmatprep.subr.bf16.mxu0 %v1723_v24  ;;  %v1779_v13 = vld [vmem:[%s2089_s6 + $0x1d4] ss:$8 sps:$4 sm:$0xff]  }
  0x77   : > { %1265 = vmatprep.subr.bf16.mxu1 %v1669_v14  ;;  %v1777_v14 = vld [vmem:[%s2089_s6 + $0x1d0] ss:$8 sps:$4 sm:$0xff]  }
  0x79   : > { %1346 = vmatpush1.bf16.msra.mxu0 %v1728_v27 }
  0x7a   : > { %1266 = vmatpush1.bf16.msra.mxu1 %v1672_v17  ;;  %1347 = vmatprep.subr.bf16.mxu0 %v1729_v28  ;;  %v1785_v17 = vld [vmem:[%s2089_s6 + $0x1f4] ss:$8 sps:$4 sm:$0xff]  }
  0x7b   : > { %1267 = vmatprep.subr.bf16.mxu1 %v1675_v18  ;;  %v1783_v18 = vld [vmem:[%s2089_s6 + $0x1f0] ss:$8 sps:$4 sm:$0xff]  }
  0x7d   : > { %1348 = vmatpush1.bf16.msra.mxu0 %v1734_v31 }
  0x7e   : > { %1268 = vmatpush1.bf16.msra.mxu1 %v1678_v21  ;;  %1349 = vmatprep.subr.bf16.mxu0 %v1735_v32 }
  0x7f   : > { %1269 = vmatprep.subr.bf16.mxu1 %v1681_v22 }
  0x81   : > { %1350 = vmatpush1.bf16.msra.mxu0 %v1740_v38 }
  0x82   : > { %1270 = vmatpush1.bf16.msra.mxu1 %v1684_v25  ;;  %1351 = vmatprep.subr.bf16.mxu0 %v1741_v41 }
  0x83   : > { %1271 = vmatprep.subr.bf16.mxu1 %v1687_v26 }
  0x85   : > { %1352 = vmatpush1.bf16.msra.mxu0 %v1746_v45 }
  0x86   : > { %1272 = vmatpush1.bf16.msra.mxu1 %v1690_v29  ;;  %1353 = vmatprep.subr.bf16.mxu0 %v1747_v46 }
  0x87   : > { %1273 = vmatprep.subr.bf16.mxu1 %v1693_v30 }
  0x89   : > { %1354 = vmatpush1.bf16.msra.mxu0 %v1752_v49 }
  0x8a   : > { %1274 = vmatpush1.bf16.msra.mxu1 %v1696_v33  ;;  %1355 = vmatprep.subr.bf16.mxu0 %v1753_v50 }
  0x8b   : > { %1284 = vmatprep.subr.bf16.mxu1 %v1703_v35 }
  0x8d   : > { %1276 = vmatmul.mubr.bf16.vlgmr.msra.gmra.mrb[0].mxu1 %v1480_v39  ;;  %1356 = vmatpush1.bf16.msra.mxu0 %v1758_v53 }
  0x8e   : > { %1285 = vmatpush1.bf16.msra.mxu1 %v1701_v42  ;;  %1316 = vmatprep.mubr.bf16.mxu1 %v1483_v43 }
  0x8f   : > { %1286 = vmatprep.subr.bf16.mxu1 %v1709_v44  ;;  %1366 = vmatprep.subr.bf16.mxu0 %v1766_v54 }
  0x90   : > { %1358 = vmatmul.mubr.bf16.vlgmr.msra.gmra.mrb[0].mxu0 %v1484_v57 }
  0x91   : > { %1367 = vmatpush1.bf16.msra.mxu0 %v1764_v58  ;;  %1398 = vmatprep.mubr.bf16.mxu0 %v1812_v40  ;;  %v1743_v40 = vld [vmem:[%s2089_s6 + $0x170] ss:$8 sps:$4 sm:$0xff]  }
  0x92   : > { %1287 = vmatpush1.bf16.msra.mxu1 %v1707_v47  ;;  %1368 = vmatprep.subr.bf16.mxu0 %v1772_v59 }
  0x93   : > { %1288 = vmatprep.subr.bf16.mxu1 %v1715_v48 }
  0x95   : > { %1369 = vmatpush1.bf16.msra.mxu0 %v1770_v62 }
  0x96   : > { %1289 = vmatpush1.bf16.msra.mxu1 %v1713_v51 }
  0x97   : > { %1290 = vmatprep.subr.bf16.mxu1 %v1721_v52 }
  0x9a   : > { %1291 = vmatpush1.bf16.msra.mxu1 %v1719_v55 }
  0x9b   : > { %1292 = vmatprep.subr.bf16.mxu1 %v1727_v56 }
  0x9c   : > { %1587 = vmatmul.mubr.msk.bf16.vlgmr.msra.gmra.mrb[0].mxu0 %vm1239_vm0, %v1776_v2 }
  0x9e   : > { %1293 = vmatpush1.bf16.msra.mxu1 %v1725_v60 }
  0x9f   : > { %1294 = vmatprep.subr.bf16.mxu1 %v1733_v61 }
  0xa2   : > { %1295 = vmatpush1.bf16.msra.mxu1 %v1731_v37 }
  0xa3   : > { %1296 = vmatprep.subr.bf16.mxu1 %v1739_v63 }
  0xa6   : > { %1297 = vmatpush1.bf16.msra.mxu1 %v1737_v0 }
  0xa7   : > { %1298 = vmatprep.subr.bf16.mxu1 %v1745_v1 }
  0xaa   : > { %1299 = vmatpush1.bf16.msra.mxu1 %v1743_v40 }
  0xab   : > { %1300 = vmatprep.subr.bf16.mxu1 %v1751_v3 }
  0xae   : > { %1301 = vmatpush1.bf16.msra.mxu1 %v1749_v4 }
  0xaf   : > { %1302 = vmatprep.subr.bf16.mxu1 %v1757_v5 }
  0xb2   : > { %1303 = vmatpush1.bf16.msra.mxu1 %v1755_v6 }
  0xb3   : > { %1304 = vmatprep.subr.bf16.mxu1 %v1763_v7 }
  0xb6   : > { %1305 = vmatpush1.bf16.msra.mxu1 %v1761_v8 }
  0xb7   : > { %1306 = vmatprep.subr.bf16.mxu1 %v1769_v9 }
  0xba   : > { %1307 = vmatpush1.bf16.msra.mxu1 %v1767_v10 }
  0xbb   : > { %1308 = vmatprep.subr.bf16.mxu1 %v1775_v11 }
  0xbe   : > { %1309 = vmatpush1.bf16.msra.mxu1 %v1773_v12 }
  0xbf   : > { %1310 = vmatprep.subr.bf16.mxu1 %v1779_v13 }
  0xc2   : > { %1311 = vmatpush1.bf16.msra.mxu1 %v1777_v14 }
  0xc3   : > { %1312 = vmatprep.subr.bf16.mxu1 %v1782_v15 }
  0xc6   : > { %1313 = vmatpush1.bf16.msra.mxu1 %v1780_v16 }
  0xc7   : > { %1314 = vmatprep.subr.bf16.mxu1 %v1785_v17 }
  0xca   : > { %1315 = vmatpush1.bf16.msra.mxu1 %v1783_v18  ;;  %v713_v24 = vpop.permute.xlu0 %712 }
  0xcd   : > { %1317 = vmatmul.mubr.bf16.vlgmr.msra.gmra.mrb[0].mxu1 %v1482_v19 }
 0x16f   : > { %v1400_v20 = vpop.f32.mrb[0].mxu0 }
 0x170   : > { %v1402_v21 = vpop.f32.mrb[1].mxu0 }
 0x171   : > { %v1404_v22 = vpop.f32.mrb[2].mxu0 }
 0x172   : > { %v1405_v23 = vpop.f32.mrb[3].mxu0 }
 0x1a0   : > { %v1318_v25 = vpop.f32.mrb[0].mxu1 }
 0x1a1   : > { %v1591_v26 = vadd.f32 %v1318_v25, %v713_v24  ;;  %v1320_v27 = vpop.f32.mrb[1].mxu1 }
 0x1a2   : > { %v1593_v28 = vadd.f32 %v1320_v27, %v713_v24  ;;  %v1322_v29 = vpop.f32.mrb[2].mxu1 }
 0x1a3   : > { %v1592_v30 = vadd.f32 %v1591_v26, %v1400_v20  ;;  %v1323_v31 = vpop.f32.mrb[3].mxu1 }
 0x1a4   : > { %v1594_v32 = vadd.f32 %v1593_v28, %v1402_v21 }
 0x1a5   : > { %1407 = vst [vmem:[%s602_s22] sm:$0xff] %v1592_v30 }
 0x1a6   : > { %1408 = vst [vmem:[%s602_s22 + $0x8] sm:$0xff] %v1594_v32 }
 0x1a7 PF: > { %p10_p9 = scmp.ge.s32.totalorder %s1850_s16, 4   ;;  %s2230_s12 = smov %s1806_s13 }
 0x1a8   : > { %s2231_s13 = smov %s1859_s19  ;;  %s2232_s14 = smov %s1850_s16 }
 0x1a9   :  { %12 = sbr.rel (!%p10_p9) target bundleno = 2 (0x2), region = 105 }

</bundles_post_ra>
